<compile_context>
chip_gen: v7x
topology: tpu7x:2x2x1
jax: 0.10.0
libtpu: 0.0.40
codegen_flags: <defaults>
</compile_context>

<pallas_src>
import math
import functools

import jax
import jax.numpy as jnp
from jax.experimental import pallas as pl
from jax.experimental.pallas import tpu as pltpu


# ---------------------------------------------------------------------------
# helpers
# ---------------------------------------------------------------------------
def _layer_norm(x, gamma, beta, eps=1e-5):
    mean = jnp.mean(x, axis=-1, keepdims=True)
    var = jnp.mean((x - mean) ** 2, axis=-1, keepdims=True)
    return (x - mean) * jax.lax.rsqrt(var + eps) * gamma + beta


# ---------------------------------------------------------------------------
# fused forward kernel
#   grid = (num_batch_chunks [parallel], num_layers [arbitrary])
#   x_scr holds the (rows, D) activations across the layer axis.
# ---------------------------------------------------------------------------
def fused_transformer_kernel(src_ref, embw_ref, peb_ref,
                             wqkv_ref, bqkv_ref, wo_ref,
                             w1_ref, b1_ref, w2_ref,
                             dvec_ref, outw_ref, outb_ref,
                             out_ref,
                             x_scr, attn_scr,
                             *, num_heads, seq_len, batch_per_chunk, matmul_dtype):
    l = pl.program_id(1)                       # layer index (innermost, "arbitrary")
    rows = batch_per_chunk * seq_len
    D = x_scr.shape[1]
    hd = D // num_heads
    scale = 1.0 / math.sqrt(hd)

    # ---- layer-0 preamble: embedding as rank-1 VPU updates (In is tiny) + PE + bias
    @pl.when(l == 0)
    def _():
        src = src_ref[...]                     # (rows, In)
        ew = embw_ref[...]                     # (In, D)
        acc = peb_ref[...]                     # pre-tiled PE + embedding bias (rows, D)
        for i in range(src.shape[1]):
            col = jnp.broadcast_to(src[:, i:i + 1], (rows, D))
            row = jnp.broadcast_to(ew[i:i + 1, :], (rows, D))
            acc = acc + col * row
        x_scr[...] = acc

    x = x_scr[...]                             # (rows, D) f32, resident in VMEM

    # ---- fused QKV projection: one MXU push with 3*D output lanes
    qkv = jnp.dot(x.astype(matmul_dtype), wqkv_ref[...],
                  preferred_element_type=jnp.float32) + bqkv_ref[...]
    q = qkv[:, :D]
    k = qkv[:, D:2 * D]
    v = qkv[:, 2 * D:]

    # ---- attention: per (batch, head); each head writes its slab straight into the
    #      (rows, D) scratch -> no lane-axis concatenate, output stays lane-dense.
    for b in range(batch_per_chunk):
        r0 = b * seq_len
        for h in range(num_heads):
            c0 = h * hd
            qh = q[r0:r0 + seq_len, c0:c0 + hd]
            kh = k[r0:r0 + seq_len, c0:c0 + hd]
            vh = v[r0:r0 + seq_len, c0:c0 + hd]
            s = jax.lax.dot_general(
                qh.astype(matmul_dtype), kh.astype(matmul_dtype),
                (((1,), (1,)), ((), ())),            # q @ k^T
                preferred_element_type=jnp.float32) * scale
            s = s - jnp.max(s, axis=-1, keepdims=True)
            p = jnp.exp(s)
            p = p * pl.reciprocal(jnp.sum(p, axis=-1, keepdims=True), approx=True)
            attn_scr[r0:r0 + seq_len, c0:c0 + hd] = jnp.dot(
                p.astype(matmul_dtype), vh.astype(matmul_dtype),
                preferred_element_type=jnp.float32)

    # dvec rows: 0=bo, 1=bf2, 2=g1, 3=be1, 4=g2, 5=be2
    attn = jnp.dot(attn_scr[...].astype(matmul_dtype), wo_ref[...],
                   preferred_element_type=jnp.float32) + dvec_ref[0:1, :]

    # residual + LayerNorm 1 (post-norm)
    x1 = _layer_norm(x + attn, dvec_ref[2:3, :], dvec_ref[3:4, :])

    # feed-forward (relu)
    h1 = jnp.dot(x1.astype(matmul_dtype), w1_ref[...],
                 preferred_element_type=jnp.float32) + b1_ref[...]
    h1 = jnp.maximum(h1, 0.0)
    h2 = jnp.dot(h1.astype(matmul_dtype), w2_ref[...],
                 preferred_element_type=jnp.float32) + dvec_ref[1:2, :]

    # residual + LayerNorm 2
    x2 = _layer_norm(x1 + h2, dvec_ref[4:5, :], dvec_ref[5:6, :])
    x_scr[...] = x2

    # ---- last layer: last token per batch row-block, fc_out as a VPU reduction
    @pl.when(l == pl.num_programs(1) - 1)
    def _():
        last_rows = [x2[b * seq_len + seq_len - 1: b * seq_len + seq_len, :]
                     for b in range(batch_per_chunk)]
        x_last = last_rows[0] if batch_per_chunk == 1 else jnp.concatenate(last_rows, axis=0)
        out_ref[...] = (jnp.sum(x_last * outw_ref[...], axis=-1, keepdims=True)
                        + outb_ref[...])


# ---------------------------------------------------------------------------
# wrapper: pack parameters, build specs, single pallas_call
# ---------------------------------------------------------------------------
def time_series_transformer_forward(src, params, pe, num_heads,
                                    *, num_batch_chunks=1,
                                    matmul_dtype=jnp.float32):
    # num_batch_chunks=2 shards the outer "parallel" axis across v7x's 2 TensorCores.
    # matmul_dtype=jnp.bfloat16 on v6e/v7x halves weight DMA bytes & uses bf16 MXU;
    # keep f32 on v5e (no bf16 VPU/EUP) — accumulation is always f32 either way.
    B, S, In = src.shape
    D = params["emb_w"].shape[1]
    layers = params["layers"]
    L = len(layers)
    F = layers[0]["w1"].shape[1]

    assert B % num_batch_chunks == 0
    Bc = B // num_batch_chunks
    rows = Bc * S

    # ---- host-side one-time packing (cuts per-layer DMA descriptor count ~5x) ----
    src_flat = src.reshape(B * S, In)
    pe_b = jnp.tile(pe, (B, 1)) + params["emb_b"]                     # PE + emb bias
    emb_w = params["emb_w"].astype(jnp.float32)

    wqkv = jnp.stack([jnp.concatenate([p["wq"], p["wk"], p["wv"]], axis=1)
                      for p in layers]).astype(matmul_dtype)          # (L, D, 3D)
    bqkv = jnp.stack([jnp.concatenate([p["bq"], p["bk"], p["bv"]], axis=1)
                      for p in layers])                               # (L, 1, 3D)
    wo = jnp.stack([p["wo"] for p in layers]).astype(matmul_dtype)    # (L, D, D)
    w1 = jnp.stack([p["w1"] for p in layers]).astype(matmul_dtype)    # (L, D, F)
    b1 = jnp.stack([p["bf1"] for p in layers])                        # (L, 1, F)
    w2 = jnp.stack([p["w2"] for p in layers]).astype(matmul_dtype)    # (L, F, D)
    dvec = jnp.stack([jnp.concatenate([p["bo"], p["bf2"], p["g1"],
                                       p["be1"], p["g2"], p["be2"]], axis=0)
                      for p in layers])                               # (L, 6, D)
    out_w = params["out_w"].T                                         # (1, D)
    out_b = params["out_b"]                                           # (1, 1)

    kernel = functools.partial(
        fused_transformer_kernel, num_heads=num_heads, seq_len=S,
        batch_per_chunk=Bc, matmul_dtype=matmul_dtype)

    chunk2 = lambda c, l: (c, 0)       # per-batch-chunk arrays
    const2 = lambda c, l: (0, 0)       # resident (loaded once) arrays
    layer3 = lambda c, l: (l, 0, 0)    # per-layer stacked weights

    grid_spec = pltpu.PrefetchScalarGridSpec(
        num_scalar_prefetch=0,
        grid=(num_batch_chunks, L),
        in_specs=[
            pl.BlockSpec((rows, In), chunk2),          # flattened input chunk
            pl.BlockSpec((In, D), const2),             # embedding weight
            pl.BlockSpec((rows, D), chunk2),           # PE + embedding bias
            pl.BlockSpec((None, D, 3 * D), layer3),    # fused Wqkv
            pl.BlockSpec((None, 1, 3 * D), layer3),    # fused qkv bias
            pl.BlockSpec((None, D, D), layer3),        # Wo
            pl.BlockSpec((None, D, F), layer3),        # FFN W1
            pl.BlockSpec((None, 1, F), layer3),        # FFN b1
            pl.BlockSpec((None, F, D), layer3),        # FFN W2
            pl.BlockSpec((None, 6, D), layer3),        # packed [bo,bf2,g1,be1,g2,be2]
            pl.BlockSpec((1, D), const2),              # fc_out weight (row form)
            pl.BlockSpec((1, 1), const2),              # fc_out bias
        ],
        out_specs=pl.BlockSpec((Bc, 1), chunk2),
        scratch_shapes=[
            pltpu.VMEM((rows, D), jnp.float32),        # resident activations
            pltpu.VMEM((rows, D), jnp.float32),        # attention output slab
        ],
    )

    return pl.pallas_call(
        kernel,
        out_shape=jax.ShapeDtypeStruct((B, 1), jnp.float32),
        grid_spec=grid_spec,
        compiler_params=pltpu.CompilerParams(
            dimension_semantics=("parallel", "arbitrary")),
    )(src_flat, emb_w, pe_b, wqkv, bqkv, wo, w1, b1, w2, dvec, out_w, out_b)


# ---------------------------------------------------------------------------
# pure-JAX reference (for a sanity check), params init, PE table
# ---------------------------------------------------------------------------
def reference_forward(src, params, pe, num_heads):
    B, S, _ = src.shape
    D = params["emb_w"].shape[1]
    H, hd = num_heads, D // num_heads
    x = src @ params["emb_w"] + params["emb_b"] + pe
    for p in params["layers"]:
        q = (x @ p["wq"] + p["bq"]).reshape(B, S, H, hd).transpose(0, 2, 1, 3)
        k = (x @ p["wk"] + p["bk"]).reshape(B, S, H, hd).transpose(0, 2, 1, 3)
        v = (x @ p["wv"] + p["bv"]).reshape(B, S, H, hd).transpose(0, 2, 1, 3)
        s = jnp.einsum('bhqd,bhkd->bhqk', q, k) / math.sqrt(hd)
        a = jax.nn.softmax(s, axis=-1)
        o = jnp.einsum('bhqk,bhkd->bhqd', a, v).transpose(0, 2, 1, 3).reshape(B, S, D)
        o = o @ p["wo"] + p["bo"]
        x = _layer_norm(x + o, p["g1"], p["be1"])
        h = jnp.maximum(x @ p["w1"] + p["bf1"], 0.0)
        h = h @ p["w2"] + p["bf2"]
        x = _layer_norm(x + h, p["g2"], p["be2"])
    return x[:, -1, :] @ params["out_w"] + params["out_b"]


def make_positional_encoding(seq_len, dim_model):
    position = jnp.arange(seq_len, dtype=jnp.float32)[:, None]
    div_term = jnp.exp(jnp.arange(0, dim_model, 2, dtype=jnp.float32)
                       * (-math.log(10000.0) / dim_model))
    pe = jnp.zeros((seq_len, dim_model), dtype=jnp.float32)
    pe = pe.at[:, 0::2].set(jnp.sin(position * div_term))
    pe = pe.at[:, 1::2].set(jnp.cos(position * div_term))
    return pe


def init_params(key, input_size, dim_model, dim_ff, num_layers):
    keys = jax.random.split(key, 2 + num_layers)

    def lin(k, fan_in, fan_out):
        kw, kb = jax.random.split(k)
        bound = 1.0 / math.sqrt(fan_in)
        w = jax.random.uniform(kw, (fan_in, fan_out), jnp.float32, -bound, bound)
        b = jax.random.uniform(kb, (1, fan_out), jnp.float32, -bound, bound)
        return w, b

    params = {}
    params["emb_w"], params["emb_b"] = lin(keys[0], input_size, dim_model)
    params["out_w"], params["out_b"] = lin(keys[1], dim_model, 1)

    layers = []
    for L in range(num_layers):
        lk = jax.random.split(keys[2 + L], 6)
        wq, bq = lin(lk[0], dim_model, dim_model)
        wk, bk = lin(lk[1], dim_model, dim_model)
        wv, bv = lin(lk[2], dim_model, dim_model)
        wo, bo = lin(lk[3], dim_model, dim_model)
        w1, bf1 = lin(lk[4], dim_model, dim_ff)
        w2, bf2 = lin(lk[5], dim_ff, dim_model)
        layers.append(dict(
            wq=wq, bq=bq, wk=wk, bk=bk, wv=wv, bv=bv, wo=wo, bo=bo,
            w1=w1, bf1=bf1, w2=w2, bf2=bf2,
            g1=jnp.ones((1, dim_model), jnp.float32),
            be1=jnp.zeros((1, dim_model), jnp.float32),
            g2=jnp.ones((1, dim_model), jnp.float32),
            be2=jnp.zeros((1, dim_model), jnp.float32),
        ))
    params["layers"] = layers
    return params


# ---------------------------------------------------------------------------
if __name__ == "__main__":
    B, S = 2, 8
    INPUT_SIZE = 4
    DIM_MODEL = 32
    NUM_HEADS = 4
    NUM_LAYERS = 2
    DIM_FF = 64

    key = jax.random.PRNGKey(0)
    k_x, k_p = jax.random.split(key)

    src = jax.random.normal(k_x, (B, S, INPUT_SIZE), dtype=jnp.float32)
    params = init_params(k_p, INPUT_SIZE, DIM_MODEL, DIM_FF, NUM_LAYERS)
    pe = make_positional_encoding(S, DIM_MODEL)

    out = time_series_transformer_forward(src, params, pe, NUM_HEADS)
    out = jax.block_until_ready(out)

    assert out.shape == (B, 1), out.shape

    ref = reference_forward(src, params, pe, NUM_HEADS)
    assert jnp.allclose(out, ref, rtol=1e-2, atol=1e-2), (out, ref)

    print("KERNEL_OK")
</pallas_src>

<mosaic_0001>
module attributes {stable_mosaic.version = 11 : i64} {
  func.func @fused_transformer_kernel(%arg0: i32, %arg1: i32, %arg2: memref<16x4xf32, #tpu.memory_space<vmem>>, %arg3: memref<4x32xf32, #tpu.memory_space<vmem>>, %arg4: memref<16x32xf32, #tpu.memory_space<vmem>>, %arg5: memref<1x32x96xf32, #tpu.memory_space<vmem>>, %arg6: memref<1x1x96xf32, #tpu.memory_space<vmem>>, %arg7: memref<1x32x32xf32, #tpu.memory_space<vmem>>, %arg8: memref<1x32x64xf32, #tpu.memory_space<vmem>>, %arg9: memref<1x1x64xf32, #tpu.memory_space<vmem>>, %arg10: memref<1x64x32xf32, #tpu.memory_space<vmem>>, %arg11: memref<1x6x32xf32, #tpu.memory_space<vmem>>, %arg12: memref<1x32xf32, #tpu.memory_space<vmem>>, %arg13: memref<1x1xf32, #tpu.memory_space<vmem>>, %arg14: memref<2x1xf32, #tpu.memory_space<vmem>>, %arg15: memref<16x32xf32, #tpu.memory_space<vmem>>, %arg16: memref<16x32xf32, #tpu.memory_space<vmem>>) attributes {dimension_semantics = [#tpu.dimension_semantics<parallel>, #tpu.dimension_semantics<arbitrary>], iteration_bounds = array<i64: 1, 2>, scalar_prefetch = 0 : i64, scratch_operands = 2 : i64, tpu.core_type = #tpu.core_type<tc>, window_params = [{transform_indices = @transform_0, window_bounds = array<i64: 16, 4>}, {pipeline_mode = #tpu.pipeline_mode<synchronous>, transform_indices = @transform_1, window_bounds = array<i64: 4, 32>}, {transform_indices = @transform_2, window_bounds = array<i64: 16, 32>}, {transform_indices = @transform_3, window_bounds = array<i64: 1, 32, 96>}, {transform_indices = @transform_4, window_bounds = array<i64: 1, 1, 96>}, {transform_indices = @transform_5, window_bounds = array<i64: 1, 32, 32>}, {transform_indices = @transform_6, window_bounds = array<i64: 1, 32, 64>}, {transform_indices = @transform_7, window_bounds = array<i64: 1, 1, 64>}, {transform_indices = @transform_8, window_bounds = array<i64: 1, 64, 32>}, {transform_indices = @transform_9, window_bounds = array<i64: 1, 6, 32>}, {pipeline_mode = #tpu.pipeline_mode<synchronous>, transform_indices = @transform_10, window_bounds = array<i64: 1, 32>}, {pipeline_mode = #tpu.pipeline_mode<synchronous>, transform_indices = @transform_11, window_bounds = array<i64: 1, 1>}, {transform_indices = @transform_12, window_bounds = array<i64: 2, 1>}]} {
    %c0_i32 = arith.constant 0 : i32
    %0 = arith.cmpi eq, %arg1, %c0_i32 : i32
    %1 = arith.extui %0 : i1 to i32
    %c0_i32_0 = arith.constant 0 : i32
    %2 = arith.cmpi ne, %1, %c0_i32_0 : i32
    scf.if %2 {
      %c0_105 = arith.constant 0 : index
      %c0_106 = arith.constant 0 : index
      %240 = vector.load %arg2[%c0_105, %c0_106] : memref<16x4xf32, #tpu.memory_space<vmem>>, vector<16x4xf32>
      %c0_107 = arith.constant 0 : index
      %c0_108 = arith.constant 0 : index
      %241 = vector.load %arg3[%c0_107, %c0_108] : memref<4x32xf32, #tpu.memory_space<vmem>>, vector<4x32xf32>
      %c0_109 = arith.constant 0 : index
      %c0_110 = arith.constant 0 : index
      %242 = vector.load %arg4[%c0_109, %c0_110] : memref<16x32xf32, #tpu.memory_space<vmem>>, vector<16x32xf32>
      %243 = vector.extract_strided_slice %240 {offsets = [0, 0], sizes = [16, 1], strides = [1, 1]} : vector<16x4xf32> to vector<16x1xf32>
      %244 = vector.shape_cast %243 : vector<16x1xf32> to vector<16x1xf32>
      %245 = vector.broadcast %244 : vector<16x1xf32> to vector<16x32xf32>
      %246 = vector.extract_strided_slice %241 {offsets = [0, 0], sizes = [1, 32], strides = [1, 1]} : vector<4x32xf32> to vector<1x32xf32>
      %247 = vector.shape_cast %246 : vector<1x32xf32> to vector<1x32xf32>
      %248 = vector.broadcast %247 : vector<1x32xf32> to vector<16x32xf32>
      %249 = arith.mulf %245, %248 : vector<16x32xf32>
      %250 = arith.addf %242, %249 : vector<16x32xf32>
      %251 = vector.extract_strided_slice %240 {offsets = [0, 1], sizes = [16, 1], strides = [1, 1]} : vector<16x4xf32> to vector<16x1xf32>
      %252 = vector.shape_cast %251 : vector<16x1xf32> to vector<16x1xf32>
      %253 = vector.broadcast %252 : vector<16x1xf32> to vector<16x32xf32>
      %254 = vector.extract_strided_slice %241 {offsets = [1, 0], sizes = [1, 32], strides = [1, 1]} : vector<4x32xf32> to vector<1x32xf32>
      %255 = vector.shape_cast %254 : vector<1x32xf32> to vector<1x32xf32>
      %256 = vector.broadcast %255 : vector<1x32xf32> to vector<16x32xf32>
      %257 = arith.mulf %253, %256 : vector<16x32xf32>
      %258 = arith.addf %250, %257 : vector<16x32xf32>
      %259 = vector.extract_strided_slice %240 {offsets = [0, 2], sizes = [16, 1], strides = [1, 1]} : vector<16x4xf32> to vector<16x1xf32>
      %260 = vector.shape_cast %259 : vector<16x1xf32> to vector<16x1xf32>
      %261 = vector.broadcast %260 : vector<16x1xf32> to vector<16x32xf32>
      %262 = vector.extract_strided_slice %241 {offsets = [2, 0], sizes = [1, 32], strides = [1, 1]} : vector<4x32xf32> to vector<1x32xf32>
      %263 = vector.shape_cast %262 : vector<1x32xf32> to vector<1x32xf32>
      %264 = vector.broadcast %263 : vector<1x32xf32> to vector<16x32xf32>
      %265 = arith.mulf %261, %264 : vector<16x32xf32>
      %266 = arith.addf %258, %265 : vector<16x32xf32>
      %267 = vector.extract_strided_slice %240 {offsets = [0, 3], sizes = [16, 1], strides = [1, 1]} : vector<16x4xf32> to vector<16x1xf32>
      %268 = vector.shape_cast %267 : vector<16x1xf32> to vector<16x1xf32>
      %269 = vector.broadcast %268 : vector<16x1xf32> to vector<16x32xf32>
      %270 = vector.extract_strided_slice %241 {offsets = [3, 0], sizes = [1, 32], strides = [1, 1]} : vector<4x32xf32> to vector<1x32xf32>
      %271 = vector.shape_cast %270 : vector<1x32xf32> to vector<1x32xf32>
      %272 = vector.broadcast %271 : vector<1x32xf32> to vector<16x32xf32>
      %273 = arith.mulf %269, %272 : vector<16x32xf32>
      %274 = arith.addf %266, %273 : vector<16x32xf32>
      %c0_111 = arith.constant 0 : index
      %c0_112 = arith.constant 0 : index
      %275 = vector.load %arg15[%c0_111, %c0_112] : memref<16x32xf32, #tpu.memory_space<vmem>>, vector<16x32xf32>
      tpu.vector_store %arg15[%c0_111, %c0_112], %274 {strides = array<i32>} : memref<16x32xf32, #tpu.memory_space<vmem>>, vector<16x32xf32>,
    } else {
    }
    %c0 = arith.constant 0 : index
    %c0_1 = arith.constant 0 : index
    %3 = vector.load %arg15[%c0, %c0_1] : memref<16x32xf32, #tpu.memory_space<vmem>>, vector<16x32xf32>
    %c0_2 = arith.constant 0 : index
    %c0_3 = arith.constant 0 : index
    %c0_4 = arith.constant 0 : index
    %4 = vector.load %arg5[%c0_2, %c0_3, %c0_4] : memref<1x32x96xf32, #tpu.memory_space<vmem>>, vector<1x32x96xf32>
    %5 = vector.shape_cast %4 : vector<1x32x96xf32> to vector<32x96xf32>
    %cst = arith.constant dense<0.000000e+00> : vector<16x96xf32>
    %6 = tpu.matmul %3, %5, %cst {dimension_numbers = #tpu.dot_dimension_numbers<[1], [0], [0], [1], [0, 0, 1, 1], [], []>} : vector<16x32xf32>, vector<32x96xf32>, vector<16x96xf32> -> vector<16x96xf32>
    %c0_5 = arith.constant 0 : index
    %c0_6 = arith.constant 0 : index
    %c0_7 = arith.constant 0 : index
    %7 = vector.load %arg6[%c0_5, %c0_6, %c0_7] : memref<1x1x96xf32, #tpu.memory_space<vmem>>, vector<1x1x96xf32>
    %8 = vector.shape_cast %7 : vector<1x1x96xf32> to vector<1x96xf32>
    %9 = vector.broadcast %8 : vector<1x96xf32> to vector<16x96xf32>
    %10 = arith.addf %6, %9 : vector<16x96xf32>
    %11 = vector.extract_strided_slice %10 {offsets = [0, 0], sizes = [16, 32], strides = [1, 1]} : vector<16x96xf32> to vector<16x32xf32>
    %12 = vector.extract_strided_slice %10 {offsets = [0, 32], sizes = [16, 32], strides = [1, 1]} : vector<16x96xf32> to vector<16x32xf32>
    %13 = vector.extract_strided_slice %10 {offsets = [0, 64], sizes = [16, 32], strides = [1, 1]} : vector<16x96xf32> to vector<16x32xf32>
    %14 = vector.extract_strided_slice %11 {offsets = [0, 0], sizes = [8, 8], strides = [1, 1]} : vector<16x32xf32> to vector<8x8xf32>
    %15 = vector.extract_strided_slice %12 {offsets = [0, 0], sizes = [8, 8], strides = [1, 1]} : vector<16x32xf32> to vector<8x8xf32>
    %16 = vector.extract_strided_slice %13 {offsets = [0, 0], sizes = [8, 8], strides = [1, 1]} : vector<16x32xf32> to vector<8x8xf32>
    %cst_8 = arith.constant dense<0.000000e+00> : vector<8x8xf32>
    %17 = tpu.matmul %14, %15, %cst_8 {dimension_numbers = #tpu.dot_dimension_numbers<[1], [1], [0], [0], [0, 0, 1, 0], [], []>} : vector<8x8xf32>, vector<8x8xf32>, vector<8x8xf32> -> vector<8x8xf32>
    %cst_9 = arith.constant 0.353553385 : f32
    %18 = vector.broadcast %cst_9 : f32 to vector<8x8xf32>
    %19 = arith.mulf %17, %18 : vector<8x8xf32>
    %cst_10 = arith.constant dense<0xFF800000> : vector<8xf32>
    %20 = vector.multi_reduction <maximumf>, %19, %cst_10 [1] : vector<8x8xf32> to vector<8xf32>
    %21 = vector.shape_cast %20 : vector<8xf32> to vector<8x1xf32>
    %22 = vector.broadcast %21 : vector<8x1xf32> to vector<8x8xf32>
    %23 = arith.subf %19, %22 : vector<8x8xf32>
    %24 = math.exp %23 : vector<8x8xf32>
    %cst_11 = arith.constant dense<0.000000e+00> : vector<8xf32>
    %25 = vector.multi_reduction <add>, %24, %cst_11 [1] : vector<8x8xf32> to vector<8xf32>
    %26 = vector.shape_cast %25 : vector<8xf32> to vector<8x1xf32>
    %27 = tpu.reciprocal %26 {approx = true} : vector<8x1xf32> -> vector<8x1xf32>
    %28 = vector.broadcast %27 : vector<8x1xf32> to vector<8x8xf32>
    %29 = arith.mulf %24, %28 : vector<8x8xf32>
    %cst_12 = arith.constant dense<0.000000e+00> : vector<8x8xf32>
    %30 = tpu.matmul %29, %16, %cst_12 {dimension_numbers = #tpu.dot_dimension_numbers<[1], [0], [0], [1], [0, 0, 1, 1], [], []>} : vector<8x8xf32>, vector<8x8xf32>, vector<8x8xf32> -> vector<8x8xf32>
    %c0_13 = arith.constant 0 : index
    %c0_14 = arith.constant 0 : index
    %31 = vector.load %arg16[%c0_13, %c0_14] : memref<16x32xf32, #tpu.memory_space<vmem>>, vector<8x8xf32>
    tpu.vector_store %arg16[%c0_13, %c0_14], %30 {strides = array<i32>} : memref<16x32xf32, #tpu.memory_space<vmem>>, vector<8x8xf32>,
    %32 = vector.extract_strided_slice %11 {offsets = [0, 8], sizes = [8, 8], strides = [1, 1]} : vector<16x32xf32> to vector<8x8xf32>
    %33 = vector.extract_strided_slice %12 {offsets = [0, 8], sizes = [8, 8], strides = [1, 1]} : vector<16x32xf32> to vector<8x8xf32>
    %34 = vector.extract_strided_slice %13 {offsets = [0, 8], sizes = [8, 8], strides = [1, 1]} : vector<16x32xf32> to vector<8x8xf32>
    %cst_15 = arith.constant dense<0.000000e+00> : vector<8x8xf32>
    %35 = tpu.matmul %32, %33, %cst_15 {dimension_numbers = #tpu.dot_dimension_numbers<[1], [1], [0], [0], [0, 0, 1, 0], [], []>} : vector<8x8xf32>, vector<8x8xf32>, vector<8x8xf32> -> vector<8x8xf32>
    %cst_16 = arith.constant 0.353553385 : f32
    %36 = vector.broadcast %cst_16 : f32 to vector<8x8xf32>
    %37 = arith.mulf %35, %36 : vector<8x8xf32>
    %cst_17 = arith.constant dense<0xFF800000> : vector<8xf32>
    %38 = vector.multi_reduction <maximumf>, %37, %cst_17 [1] : vector<8x8xf32> to vector<8xf32>
    %39 = vector.shape_cast %38 : vector<8xf32> to vector<8x1xf32>
    %40 = vector.broadcast %39 : vector<8x1xf32> to vector<8x8xf32>
    %41 = arith.subf %37, %40 : vector<8x8xf32>
    %42 = math.exp %41 : vector<8x8xf32>
    %cst_18 = arith.constant dense<0.000000e+00> : vector<8xf32>
    %43 = vector.multi_reduction <add>, %42, %cst_18 [1] : vector<8x8xf32> to vector<8xf32>
    %44 = vector.shape_cast %43 : vector<8xf32> to vector<8x1xf32>
    %45 = tpu.reciprocal %44 {approx = true} : vector<8x1xf32> -> vector<8x1xf32>
    %46 = vector.broadcast %45 : vector<8x1xf32> to vector<8x8xf32>
    %47 = arith.mulf %42, %46 : vector<8x8xf32>
    %cst_19 = arith.constant dense<0.000000e+00> : vector<8x8xf32>
    %48 = tpu.matmul %47, %34, %cst_19 {dimension_numbers = #tpu.dot_dimension_numbers<[1], [0], [0], [1], [0, 0, 1, 1], [], []>} : vector<8x8xf32>, vector<8x8xf32>, vector<8x8xf32> -> vector<8x8xf32>
    %c0_20 = arith.constant 0 : index
    %c8 = arith.constant 8 : index
    %49 = vector.load %arg16[%c0_20, %c8] : memref<16x32xf32, #tpu.memory_space<vmem>>, vector<8x8xf32>
    tpu.vector_store %arg16[%c0_20, %c8], %48 {strides = array<i32>} : memref<16x32xf32, #tpu.memory_space<vmem>>, vector<8x8xf32>,
    %50 = vector.extract_strided_slice %11 {offsets = [0, 16], sizes = [8, 8], strides = [1, 1]} : vector<16x32xf32> to vector<8x8xf32>
    %51 = vector.extract_strided_slice %12 {offsets = [0, 16], sizes = [8, 8], strides = [1, 1]} : vector<16x32xf32> to vector<8x8xf32>
    %52 = vector.extract_strided_slice %13 {offsets = [0, 16], sizes = [8, 8], strides = [1, 1]} : vector<16x32xf32> to vector<8x8xf32>
    %cst_21 = arith.constant dense<0.000000e+00> : vector<8x8xf32>
    %53 = tpu.matmul %50, %51, %cst_21 {dimension_numbers = #tpu.dot_dimension_numbers<[1], [1], [0], [0], [0, 0, 1, 0], [], []>} : vector<8x8xf32>, vector<8x8xf32>, vector<8x8xf32> -> vector<8x8xf32>
    %cst_22 = arith.constant 0.353553385 : f32
    %54 = vector.broadcast %cst_22 : f32 to vector<8x8xf32>
    %55 = arith.mulf %53, %54 : vector<8x8xf32>
    %cst_23 = arith.constant dense<0xFF800000> : vector<8xf32>
    %56 = vector.multi_reduction <maximumf>, %55, %cst_23 [1] : vector<8x8xf32> to vector<8xf32>
    %57 = vector.shape_cast %56 : vector<8xf32> to vector<8x1xf32>
    %58 = vector.broadcast %57 : vector<8x1xf32> to vector<8x8xf32>
    %59 = arith.subf %55, %58 : vector<8x8xf32>
    %60 = math.exp %59 : vector<8x8xf32>
    %cst_24 = arith.constant dense<0.000000e+00> : vector<8xf32>
    %61 = vector.multi_reduction <add>, %60, %cst_24 [1] : vector<8x8xf32> to vector<8xf32>
    %62 = vector.shape_cast %61 : vector<8xf32> to vector<8x1xf32>
    %63 = tpu.reciprocal %62 {approx = true} : vector<8x1xf32> -> vector<8x1xf32>
    %64 = vector.broadcast %63 : vector<8x1xf32> to vector<8x8xf32>
    %65 = arith.mulf %60, %64 : vector<8x8xf32>
    %cst_25 = arith.constant dense<0.000000e+00> : vector<8x8xf32>
    %66 = tpu.matmul %65, %52, %cst_25 {dimension_numbers = #tpu.dot_dimension_numbers<[1], [0], [0], [1], [0, 0, 1, 1], [], []>} : vector<8x8xf32>, vector<8x8xf32>, vector<8x8xf32> -> vector<8x8xf32>
    %c0_26 = arith.constant 0 : index
    %c16 = arith.constant 16 : index
    %67 = vector.load %arg16[%c0_26, %c16] : memref<16x32xf32, #tpu.memory_space<vmem>>, vector<8x8xf32>
    tpu.vector_store %arg16[%c0_26, %c16], %66 {strides = array<i32>} : memref<16x32xf32, #tpu.memory_space<vmem>>, vector<8x8xf32>,
    %68 = vector.extract_strided_slice %11 {offsets = [0, 24], sizes = [8, 8], strides = [1, 1]} : vector<16x32xf32> to vector<8x8xf32>
    %69 = vector.extract_strided_slice %12 {offsets = [0, 24], sizes = [8, 8], strides = [1, 1]} : vector<16x32xf32> to vector<8x8xf32>
    %70 = vector.extract_strided_slice %13 {offsets = [0, 24], sizes = [8, 8], strides = [1, 1]} : vector<16x32xf32> to vector<8x8xf32>
    %cst_27 = arith.constant dense<0.000000e+00> : vector<8x8xf32>
    %71 = tpu.matmul %68, %69, %cst_27 {dimension_numbers = #tpu.dot_dimension_numbers<[1], [1], [0], [0], [0, 0, 1, 0], [], []>} : vector<8x8xf32>, vector<8x8xf32>, vector<8x8xf32> -> vector<8x8xf32>
    %cst_28 = arith.constant 0.353553385 : f32
    %72 = vector.broadcast %cst_28 : f32 to vector<8x8xf32>
    %73 = arith.mulf %71, %72 : vector<8x8xf32>
    %cst_29 = arith.constant dense<0xFF800000> : vector<8xf32>
    %74 = vector.multi_reduction <maximumf>, %73, %cst_29 [1] : vector<8x8xf32> to vector<8xf32>
    %75 = vector.shape_cast %74 : vector<8xf32> to vector<8x1xf32>
    %76 = vector.broadcast %75 : vector<8x1xf32> to vector<8x8xf32>
    %77 = arith.subf %73, %76 : vector<8x8xf32>
    %78 = math.exp %77 : vector<8x8xf32>
    %cst_30 = arith.constant dense<0.000000e+00> : vector<8xf32>
    %79 = vector.multi_reduction <add>, %78, %cst_30 [1] : vector<8x8xf32> to vector<8xf32>
    %80 = vector.shape_cast %79 : vector<8xf32> to vector<8x1xf32>
    %81 = tpu.reciprocal %80 {approx = true} : vector<8x1xf32> -> vector<8x1xf32>
    %82 = vector.broadcast %81 : vector<8x1xf32> to vector<8x8xf32>
    %83 = arith.mulf %78, %82 : vector<8x8xf32>
    %cst_31 = arith.constant dense<0.000000e+00> : vector<8x8xf32>
    %84 = tpu.matmul %83, %70, %cst_31 {dimension_numbers = #tpu.dot_dimension_numbers<[1], [0], [0], [1], [0, 0, 1, 1], [], []>} : vector<8x8xf32>, vector<8x8xf32>, vector<8x8xf32> -> vector<8x8xf32>
    %c0_32 = arith.constant 0 : index
    %c24 = arith.constant 24 : index
    %85 = vector.load %arg16[%c0_32, %c24] : memref<16x32xf32, #tpu.memory_space<vmem>>, vector<8x8xf32>
    tpu.vector_store %arg16[%c0_32, %c24], %84 {strides = array<i32>} : memref<16x32xf32, #tpu.memory_space<vmem>>, vector<8x8xf32>,
    %86 = vector.extract_strided_slice %11 {offsets = [8, 0], sizes = [8, 8], strides = [1, 1]} : vector<16x32xf32> to vector<8x8xf32>
    %87 = vector.extract_strided_slice %12 {offsets = [8, 0], sizes = [8, 8], strides = [1, 1]} : vector<16x32xf32> to vector<8x8xf32>
    %88 = vector.extract_strided_slice %13 {offsets = [8, 0], sizes = [8, 8], strides = [1, 1]} : vector<16x32xf32> to vector<8x8xf32>
    %cst_33 = arith.constant dense<0.000000e+00> : vector<8x8xf32>
    %89 = tpu.matmul %86, %87, %cst_33 {dimension_numbers = #tpu.dot_dimension_numbers<[1], [1], [0], [0], [0, 0, 1, 0], [], []>} : vector<8x8xf32>, vector<8x8xf32>, vector<8x8xf32> -> vector<8x8xf32>
    %cst_34 = arith.constant 0.353553385 : f32
    %90 = vector.broadcast %cst_34 : f32 to vector<8x8xf32>
    %91 = arith.mulf %89, %90 : vector<8x8xf32>
    %cst_35 = arith.constant dense<0xFF800000> : vector<8xf32>
    %92 = vector.multi_reduction <maximumf>, %91, %cst_35 [1] : vector<8x8xf32> to vector<8xf32>
    %93 = vector.shape_cast %92 : vector<8xf32> to vector<8x1xf32>
    %94 = vector.broadcast %93 : vector<8x1xf32> to vector<8x8xf32>
    %95 = arith.subf %91, %94 : vector<8x8xf32>
    %96 = math.exp %95 : vector<8x8xf32>
    %cst_36 = arith.constant dense<0.000000e+00> : vector<8xf32>
    %97 = vector.multi_reduction <add>, %96, %cst_36 [1] : vector<8x8xf32> to vector<8xf32>
    %98 = vector.shape_cast %97 : vector<8xf32> to vector<8x1xf32>
    %99 = tpu.reciprocal %98 {approx = true} : vector<8x1xf32> -> vector<8x1xf32>
    %100 = vector.broadcast %99 : vector<8x1xf32> to vector<8x8xf32>
    %101 = arith.mulf %96, %100 : vector<8x8xf32>
    %cst_37 = arith.constant dense<0.000000e+00> : vector<8x8xf32>
    %102 = tpu.matmul %101, %88, %cst_37 {dimension_numbers = #tpu.dot_dimension_numbers<[1], [0], [0], [1], [0, 0, 1, 1], [], []>} : vector<8x8xf32>, vector<8x8xf32>, vector<8x8xf32> -> vector<8x8xf32>
    %c8_38 = arith.constant 8 : index
    %c0_39 = arith.constant 0 : index
    %103 = vector.load %arg16[%c8_38, %c0_39] : memref<16x32xf32, #tpu.memory_space<vmem>>, vector<8x8xf32>
    tpu.vector_store %arg16[%c8_38, %c0_39], %102 {strides = array<i32>} : memref<16x32xf32, #tpu.memory_space<vmem>>, vector<8x8xf32>,
    %104 = vector.extract_strided_slice %11 {offsets = [8, 8], sizes = [8, 8], strides = [1, 1]} : vector<16x32xf32> to vector<8x8xf32>
    %105 = vector.extract_strided_slice %12 {offsets = [8, 8], sizes = [8, 8], strides = [1, 1]} : vector<16x32xf32> to vector<8x8xf32>
    %106 = vector.extract_strided_slice %13 {offsets = [8, 8], sizes = [8, 8], strides = [1, 1]} : vector<16x32xf32> to vector<8x8xf32>
    %cst_40 = arith.constant dense<0.000000e+00> : vector<8x8xf32>
    %107 = tpu.matmul %104, %105, %cst_40 {dimension_numbers = #tpu.dot_dimension_numbers<[1], [1], [0], [0], [0, 0, 1, 0], [], []>} : vector<8x8xf32>, vector<8x8xf32>, vector<8x8xf32> -> vector<8x8xf32>
    %cst_41 = arith.constant 0.353553385 : f32
    %108 = vector.broadcast %cst_41 : f32 to vector<8x8xf32>
    %109 = arith.mulf %107, %108 : vector<8x8xf32>
    %cst_42 = arith.constant dense<0xFF800000> : vector<8xf32>
    %110 = vector.multi_reduction <maximumf>, %109, %cst_42 [1] : vector<8x8xf32> to vector<8xf32>
    %111 = vector.shape_cast %110 : vector<8xf32> to vector<8x1xf32>
    %112 = vector.broadcast %111 : vector<8x1xf32> to vector<8x8xf32>
    %113 = arith.subf %109, %112 : vector<8x8xf32>
    %114 = math.exp %113 : vector<8x8xf32>
    %cst_43 = arith.constant dense<0.000000e+00> : vector<8xf32>
    %115 = vector.multi_reduction <add>, %114, %cst_43 [1] : vector<8x8xf32> to vector<8xf32>
    %116 = vector.shape_cast %115 : vector<8xf32> to vector<8x1xf32>
    %117 = tpu.reciprocal %116 {approx = true} : vector<8x1xf32> -> vector<8x1xf32>
    %118 = vector.broadcast %117 : vector<8x1xf32> to vector<8x8xf32>
    %119 = arith.mulf %114, %118 : vector<8x8xf32>
    %cst_44 = arith.constant dense<0.000000e+00> : vector<8x8xf32>
    %120 = tpu.matmul %119, %106, %cst_44 {dimension_numbers = #tpu.dot_dimension_numbers<[1], [0], [0], [1], [0, 0, 1, 1], [], []>} : vector<8x8xf32>, vector<8x8xf32>, vector<8x8xf32> -> vector<8x8xf32>
    %c8_45 = arith.constant 8 : index
    %c8_46 = arith.constant 8 : index
    %121 = vector.load %arg16[%c8_45, %c8_46] : memref<16x32xf32, #tpu.memory_space<vmem>>, vector<8x8xf32>
    tpu.vector_store %arg16[%c8_45, %c8_46], %120 {strides = array<i32>} : memref<16x32xf32, #tpu.memory_space<vmem>>, vector<8x8xf32>,
    %122 = vector.extract_strided_slice %11 {offsets = [8, 16], sizes = [8, 8], strides = [1, 1]} : vector<16x32xf32> to vector<8x8xf32>
    %123 = vector.extract_strided_slice %12 {offsets = [8, 16], sizes = [8, 8], strides = [1, 1]} : vector<16x32xf32> to vector<8x8xf32>
    %124 = vector.extract_strided_slice %13 {offsets = [8, 16], sizes = [8, 8], strides = [1, 1]} : vector<16x32xf32> to vector<8x8xf32>
    %cst_47 = arith.constant dense<0.000000e+00> : vector<8x8xf32>
    %125 = tpu.matmul %122, %123, %cst_47 {dimension_numbers = #tpu.dot_dimension_numbers<[1], [1], [0], [0], [0, 0, 1, 0], [], []>} : vector<8x8xf32>, vector<8x8xf32>, vector<8x8xf32> -> vector<8x8xf32>
    %cst_48 = arith.constant 0.353553385 : f32
    %126 = vector.broadcast %cst_48 : f32 to vector<8x8xf32>
    %127 = arith.mulf %125, %126 : vector<8x8xf32>
    %cst_49 = arith.constant dense<0xFF800000> : vector<8xf32>
    %128 = vector.multi_reduction <maximumf>, %127, %cst_49 [1] : vector<8x8xf32> to vector<8xf32>
    %129 = vector.shape_cast %128 : vector<8xf32> to vector<8x1xf32>
    %130 = vector.broadcast %129 : vector<8x1xf32> to vector<8x8xf32>
    %131 = arith.subf %127, %130 : vector<8x8xf32>
    %132 = math.exp %131 : vector<8x8xf32>
    %cst_50 = arith.constant dense<0.000000e+00> : vector<8xf32>
    %133 = vector.multi_reduction <add>, %132, %cst_50 [1] : vector<8x8xf32> to vector<8xf32>
    %134 = vector.shape_cast %133 : vector<8xf32> to vector<8x1xf32>
    %135 = tpu.reciprocal %134 {approx = true} : vector<8x1xf32> -> vector<8x1xf32>
    %136 = vector.broadcast %135 : vector<8x1xf32> to vector<8x8xf32>
    %137 = arith.mulf %132, %136 : vector<8x8xf32>
    %cst_51 = arith.constant dense<0.000000e+00> : vector<8x8xf32>
    %138 = tpu.matmul %137, %124, %cst_51 {dimension_numbers = #tpu.dot_dimension_numbers<[1], [0], [0], [1], [0, 0, 1, 1], [], []>} : vector<8x8xf32>, vector<8x8xf32>, vector<8x8xf32> -> vector<8x8xf32>
    %c8_52 = arith.constant 8 : index
    %c16_53 = arith.constant 16 : index
    %139 = vector.load %arg16[%c8_52, %c16_53] : memref<16x32xf32, #tpu.memory_space<vmem>>, vector<8x8xf32>
    tpu.vector_store %arg16[%c8_52, %c16_53], %138 {strides = array<i32>} : memref<16x32xf32, #tpu.memory_space<vmem>>, vector<8x8xf32>,
    %140 = vector.extract_strided_slice %11 {offsets = [8, 24], sizes = [8, 8], strides = [1, 1]} : vector<16x32xf32> to vector<8x8xf32>
    %141 = vector.extract_strided_slice %12 {offsets = [8, 24], sizes = [8, 8], strides = [1, 1]} : vector<16x32xf32> to vector<8x8xf32>
    %142 = vector.extract_strided_slice %13 {offsets = [8, 24], sizes = [8, 8], strides = [1, 1]} : vector<16x32xf32> to vector<8x8xf32>
    %cst_54 = arith.constant dense<0.000000e+00> : vector<8x8xf32>
    %143 = tpu.matmul %140, %141, %cst_54 {dimension_numbers = #tpu.dot_dimension_numbers<[1], [1], [0], [0], [0, 0, 1, 0], [], []>} : vector<8x8xf32>, vector<8x8xf32>, vector<8x8xf32> -> vector<8x8xf32>
    %cst_55 = arith.constant 0.353553385 : f32
    %144 = vector.broadcast %cst_55 : f32 to vector<8x8xf32>
    %145 = arith.mulf %143, %144 : vector<8x8xf32>
    %cst_56 = arith.constant dense<0xFF800000> : vector<8xf32>
    %146 = vector.multi_reduction <maximumf>, %145, %cst_56 [1] : vector<8x8xf32> to vector<8xf32>
    %147 = vector.shape_cast %146 : vector<8xf32> to vector<8x1xf32>
    %148 = vector.broadcast %147 : vector<8x1xf32> to vector<8x8xf32>
    %149 = arith.subf %145, %148 : vector<8x8xf32>
    %150 = math.exp %149 : vector<8x8xf32>
    %cst_57 = arith.constant dense<0.000000e+00> : vector<8xf32>
    %151 = vector.multi_reduction <add>, %150, %cst_57 [1] : vector<8x8xf32> to vector<8xf32>
    %152 = vector.shape_cast %151 : vector<8xf32> to vector<8x1xf32>
    %153 = tpu.reciprocal %152 {approx = true} : vector<8x1xf32> -> vector<8x1xf32>
    %154 = vector.broadcast %153 : vector<8x1xf32> to vector<8x8xf32>
    %155 = arith.mulf %150, %154 : vector<8x8xf32>
    %cst_58 = arith.constant dense<0.000000e+00> : vector<8x8xf32>
    %156 = tpu.matmul %155, %142, %cst_58 {dimension_numbers = #tpu.dot_dimension_numbers<[1], [0], [0], [1], [0, 0, 1, 1], [], []>} : vector<8x8xf32>, vector<8x8xf32>, vector<8x8xf32> -> vector<8x8xf32>
    %c8_59 = arith.constant 8 : index
    %c24_60 = arith.constant 24 : index
    %157 = vector.load %arg16[%c8_59, %c24_60] : memref<16x32xf32, #tpu.memory_space<vmem>>, vector<8x8xf32>
    tpu.vector_store %arg16[%c8_59, %c24_60], %156 {strides = array<i32>} : memref<16x32xf32, #tpu.memory_space<vmem>>, vector<8x8xf32>,
    %c0_61 = arith.constant 0 : index
    %c0_62 = arith.constant 0 : index
    %158 = vector.load %arg16[%c0_61, %c0_62] : memref<16x32xf32, #tpu.memory_space<vmem>>, vector<16x32xf32>
    %c0_63 = arith.constant 0 : index
    %c0_64 = arith.constant 0 : index
    %c0_65 = arith.constant 0 : index
    %159 = vector.load %arg7[%c0_63, %c0_64, %c0_65] : memref<1x32x32xf32, #tpu.memory_space<vmem>>, vector<1x32x32xf32>
    %160 = vector.shape_cast %159 : vector<1x32x32xf32> to vector<32x32xf32>
    %cst_66 = arith.constant dense<0.000000e+00> : vector<16x32xf32>
    %161 = tpu.matmul %158, %160, %cst_66 {dimension_numbers = #tpu.dot_dimension_numbers<[1], [0], [0], [1], [0, 0, 1, 1], [], []>} : vector<16x32xf32>, vector<32x32xf32>, vector<16x32xf32> -> vector<16x32xf32>
    %c0_67 = arith.constant 0 : index
    %c0_68 = arith.constant 0 : index
    %c0_69 = arith.constant 0 : index
    %162 = vector.load %arg11[%c0_67, %c0_68, %c0_69] : memref<1x6x32xf32, #tpu.memory_space<vmem>>, vector<1x1x32xf32>
    %163 = vector.shape_cast %162 : vector<1x1x32xf32> to vector<1x32xf32>
    %164 = vector.broadcast %163 : vector<1x32xf32> to vector<16x32xf32>
    %165 = arith.addf %161, %164 : vector<16x32xf32>
    %166 = arith.addf %3, %165 : vector<16x32xf32>
    %c0_70 = arith.constant 0 : index
    %c2 = arith.constant 2 : index
    %c0_71 = arith.constant 0 : index
    %167 = vector.load %arg11[%c0_70, %c2, %c0_71] : memref<1x6x32xf32, #tpu.memory_space<vmem>>, vector<1x1x32xf32>
    %168 = vector.shape_cast %167 : vector<1x1x32xf32> to vector<1x32xf32>
    %c0_72 = arith.constant 0 : index
    %c3 = arith.constant 3 : index
    %c0_73 = arith.constant 0 : index
    %169 = vector.load %arg11[%c0_72, %c3, %c0_73] : memref<1x6x32xf32, #tpu.memory_space<vmem>>, vector<1x1x32xf32>
    %170 = vector.shape_cast %169 : vector<1x1x32xf32> to vector<1x32xf32>
    %cst_74 = arith.constant dense<0.000000e+00> : vector<16xf32>
    %171 = vector.multi_reduction <add>, %166, %cst_74 [1] : vector<16x32xf32> to vector<16xf32>
    %172 = vector.shape_cast %171 : vector<16xf32> to vector<16x1xf32>
    %cst_75 = arith.constant 3.200000e+01 : f32
    %173 = vector.broadcast %cst_75 : f32 to vector<16x1xf32>
    %174 = arith.divf %172, %173 : vector<16x1xf32>
    %175 = vector.broadcast %174 : vector<16x1xf32> to vector<16x32xf32>
    %176 = arith.subf %166, %175 : vector<16x32xf32>
    %177 = arith.mulf %176, %176 : vector<16x32xf32>
    %cst_76 = arith.constant dense<0.000000e+00> : vector<16xf32>
    %178 = vector.multi_reduction <add>, %177, %cst_76 [1] : vector<16x32xf32> to vector<16xf32>
    %179 = vector.shape_cast %178 : vector<16xf32> to vector<16x1xf32>
    %cst_77 = arith.constant 3.200000e+01 : f32
    %180 = vector.broadcast %cst_77 : f32 to vector<16x1xf32>
    %181 = arith.divf %179, %180 : vector<16x1xf32>
    %182 = vector.broadcast %174 : vector<16x1xf32> to vector<16x32xf32>
    %183 = arith.subf %166, %182 : vector<16x32xf32>
    %cst_78 = arith.constant 9.99999974E-6 : f32
    %184 = vector.broadcast %cst_78 : f32 to vector<16x1xf32>
    %185 = arith.addf %181, %184 : vector<16x1xf32>
    %186 = math.rsqrt %185 : vector<16x1xf32>
    %187 = vector.broadcast %186 : vector<16x1xf32> to vector<16x32xf32>
    %188 = arith.mulf %183, %187 : vector<16x32xf32>
    %189 = vector.broadcast %168 : vector<1x32xf32> to vector<16x32xf32>
    %190 = arith.mulf %188, %189 : vector<16x32xf32>
    %191 = vector.broadcast %170 : vector<1x32xf32> to vector<16x32xf32>
    %192 = arith.addf %190, %191 : vector<16x32xf32>
    %c0_79 = arith.constant 0 : index
    %c0_80 = arith.constant 0 : index
    %c0_81 = arith.constant 0 : index
    %193 = vector.load %arg8[%c0_79, %c0_80, %c0_81] : memref<1x32x64xf32, #tpu.memory_space<vmem>>, vector<1x32x64xf32>
    %194 = vector.shape_cast %193 : vector<1x32x64xf32> to vector<32x64xf32>
    %cst_82 = arith.constant dense<0.000000e+00> : vector<16x64xf32>
    %195 = tpu.matmul %192, %194, %cst_82 {dimension_numbers = #tpu.dot_dimension_numbers<[1], [0], [0], [1], [0, 0, 1, 1], [], []>} : vector<16x32xf32>, vector<32x64xf32>, vector<16x64xf32> -> vector<16x64xf32>
    %c0_83 = arith.constant 0 : index
    %c0_84 = arith.constant 0 : index
    %c0_85 = arith.constant 0 : index
    %196 = vector.load %arg9[%c0_83, %c0_84, %c0_85] : memref<1x1x64xf32, #tpu.memory_space<vmem>>, vector<1x1x64xf32>
    %197 = vector.shape_cast %196 : vector<1x1x64xf32> to vector<1x64xf32>
    %198 = vector.broadcast %197 : vector<1x64xf32> to vector<16x64xf32>
    %199 = arith.addf %195, %198 : vector<16x64xf32>
    %cst_86 = arith.constant 0.000000e+00 : f32
    %200 = vector.broadcast %cst_86 : f32 to vector<16x64xf32>
    %201 = arith.maximumf %199, %200 : vector<16x64xf32>
    %c0_87 = arith.constant 0 : index
    %c0_88 = arith.constant 0 : index
    %c0_89 = arith.constant 0 : index
    %202 = vector.load %arg10[%c0_87, %c0_88, %c0_89] : memref<1x64x32xf32, #tpu.memory_space<vmem>>, vector<1x64x32xf32>
    %203 = vector.shape_cast %202 : vector<1x64x32xf32> to vector<64x32xf32>
    %cst_90 = arith.constant dense<0.000000e+00> : vector<16x32xf32>
    %204 = tpu.matmul %201, %203, %cst_90 {dimension_numbers = #tpu.dot_dimension_numbers<[1], [0], [0], [1], [0, 0, 1, 1], [], []>} : vector<16x64xf32>, vector<64x32xf32>, vector<16x32xf32> -> vector<16x32xf32>
    %c0_91 = arith.constant 0 : index
    %c1 = arith.constant 1 : index
    %c0_92 = arith.constant 0 : index
    %205 = vector.load %arg11[%c0_91, %c1, %c0_92] : memref<1x6x32xf32, #tpu.memory_space<vmem>>, vector<1x1x32xf32>
    %206 = vector.shape_cast %205 : vector<1x1x32xf32> to vector<1x32xf32>
    %207 = vector.broadcast %206 : vector<1x32xf32> to vector<16x32xf32>
    %208 = arith.addf %204, %207 : vector<16x32xf32>
    %209 = arith.addf %192, %208 : vector<16x32xf32>
    %c0_93 = arith.constant 0 : index
    %c4 = arith.constant 4 : index
    %c0_94 = arith.constant 0 : index
    %210 = vector.load %arg11[%c0_93, %c4, %c0_94] : memref<1x6x32xf32, #tpu.memory_space<vmem>>, vector<1x1x32xf32>
    %211 = vector.shape_cast %210 : vector<1x1x32xf32> to vector<1x32xf32>
    %c0_95 = arith.constant 0 : index
    %c5 = arith.constant 5 : index
    %c0_96 = arith.constant 0 : index
    %212 = vector.load %arg11[%c0_95, %c5, %c0_96] : memref<1x6x32xf32, #tpu.memory_space<vmem>>, vector<1x1x32xf32>
    %213 = vector.shape_cast %212 : vector<1x1x32xf32> to vector<1x32xf32>
    %cst_97 = arith.constant dense<0.000000e+00> : vector<16xf32>
    %214 = vector.multi_reduction <add>, %209, %cst_97 [1] : vector<16x32xf32> to vector<16xf32>
    %215 = vector.shape_cast %214 : vector<16xf32> to vector<16x1xf32>
    %cst_98 = arith.constant 3.200000e+01 : f32
    %216 = vector.broadcast %cst_98 : f32 to vector<16x1xf32>
    %217 = arith.divf %215, %216 : vector<16x1xf32>
    %218 = vector.broadcast %217 : vector<16x1xf32> to vector<16x32xf32>
    %219 = arith.subf %209, %218 : vector<16x32xf32>
    %220 = arith.mulf %219, %219 : vector<16x32xf32>
    %cst_99 = arith.constant dense<0.000000e+00> : vector<16xf32>
    %221 = vector.multi_reduction <add>, %220, %cst_99 [1] : vector<16x32xf32> to vector<16xf32>
    %222 = vector.shape_cast %221 : vector<16xf32> to vector<16x1xf32>
    %cst_100 = arith.constant 3.200000e+01 : f32
    %223 = vector.broadcast %cst_100 : f32 to vector<16x1xf32>
    %224 = arith.divf %222, %223 : vector<16x1xf32>
    %225 = vector.broadcast %217 : vector<16x1xf32> to vector<16x32xf32>
    %226 = arith.subf %209, %225 : vector<16x32xf32>
    %cst_101 = arith.constant 9.99999974E-6 : f32
    %227 = vector.broadcast %cst_101 : f32 to vector<16x1xf32>
    %228 = arith.addf %224, %227 : vector<16x1xf32>
    %229 = math.rsqrt %228 : vector<16x1xf32>
    %230 = vector.broadcast %229 : vector<16x1xf32> to vector<16x32xf32>
    %231 = arith.mulf %226, %230 : vector<16x32xf32>
    %232 = vector.broadcast %211 : vector<1x32xf32> to vector<16x32xf32>
    %233 = arith.mulf %231, %232 : vector<16x32xf32>
    %234 = vector.broadcast %213 : vector<1x32xf32> to vector<16x32xf32>
    %235 = arith.addf %233, %234 : vector<16x32xf32>
    %c0_102 = arith.constant 0 : index
    %c0_103 = arith.constant 0 : index
    %236 = vector.load %arg15[%c0_102, %c0_103] : memref<16x32xf32, #tpu.memory_space<vmem>>, vector<16x32xf32>
    tpu.vector_store %arg15[%c0_102, %c0_103], %235 {strides = array<i32>} : memref<16x32xf32, #tpu.memory_space<vmem>>, vector<16x32xf32>,
    %c1_i32 = arith.constant 1 : i32
    %237 = arith.cmpi eq, %arg1, %c1_i32 : i32
    %238 = arith.extui %237 : i1 to i32
    %c0_i32_104 = arith.constant 0 : i32
    %239 = arith.cmpi ne, %238, %c0_i32_104 : i32
    scf.if %239 {
      %240 = vector.extract_strided_slice %235 {offsets = [7, 0], sizes = [1, 32], strides = [1, 1]} : vector<16x32xf32> to vector<1x32xf32>
      %241 = vector.extract_strided_slice %235 {offsets = [15, 0], sizes = [1, 32], strides = [1, 1]} : vector<16x32xf32> to vector<1x32xf32>
      %242 = tpu.concatenate %240, %241 in 0 : vector<1x32xf32>, vector<1x32xf32> -> vector<2x32xf32>
      %c0_105 = arith.constant 0 : index
      %c0_106 = arith.constant 0 : index
      %243 = vector.load %arg12[%c0_105, %c0_106] : memref<1x32xf32, #tpu.memory_space<vmem>>, vector<1x32xf32>
      %244 = vector.broadcast %243 : vector<1x32xf32> to vector<2x32xf32>
      %245 = arith.mulf %242, %244 : vector<2x32xf32>
      %cst_107 = arith.constant dense<0.000000e+00> : vector<2xf32>
      %246 = vector.multi_reduction <add>, %245, %cst_107 [1] : vector<2x32xf32> to vector<2xf32>
      %247 = vector.shape_cast %246 : vector<2xf32> to vector<2x1xf32>
      %c0_108 = arith.constant 0 : index
      %c0_109 = arith.constant 0 : index
      %248 = vector.load %arg13[%c0_108, %c0_109] : memref<1x1xf32, #tpu.memory_space<vmem>>, vector<1x1xf32>
      %249 = vector.broadcast %248 : vector<1x1xf32> to vector<2x1xf32>
      %250 = arith.addf %247, %249 : vector<2x1xf32>
      %c0_110 = arith.constant 0 : index
      %c0_111 = arith.constant 0 : index
      %251 = vector.load %arg14[%c0_110, %c0_111] : memref<2x1xf32, #tpu.memory_space<vmem>>, vector<2x1xf32>
      tpu.vector_store %arg14[%c0_110, %c0_111], %250 {strides = array<i32>} : memref<2x1xf32, #tpu.memory_space<vmem>>, vector<2x1xf32>,
    } else {
    }
    return
  }
  func.func @transform_0(%arg0: i32, %arg1: i32) -> (i32, i32) {
    %c0_i32 = arith.constant 0 : i32
    %c0_i32_0 = arith.constant 0 : i32
    return %arg0, %c0_i32 : i32, i32
  }
  func.func @transform_1(%arg0: i32, %arg1: i32) -> (i32, i32) {
    %c0_i32 = arith.constant 0 : i32
    %c0_i32_0 = arith.constant 0 : i32
    %c0_i32_1 = arith.constant 0 : i32
    return %c0_i32, %c0_i32_0 : i32, i32
  }
  func.func @transform_2(%arg0: i32, %arg1: i32) -> (i32, i32) {
    %c0_i32 = arith.constant 0 : i32
    %c0_i32_0 = arith.constant 0 : i32
    return %arg0, %c0_i32 : i32, i32
  }
  func.func @transform_3(%arg0: i32, %arg1: i32) -> (i32, i32, i32) {
    %c0_i32 = arith.constant 0 : i32
    %c0_i32_0 = arith.constant 0 : i32
    %c0_i32_1 = arith.constant 0 : i32
    return %arg1, %c0_i32, %c0_i32_0 : i32, i32, i32
  }
  func.func @transform_4(%arg0: i32, %arg1: i32) -> (i32, i32, i32) {
    %c0_i32 = arith.constant 0 : i32
    %c0_i32_0 = arith.constant 0 : i32
    %c0_i32_1 = arith.constant 0 : i32
    return %arg1, %c0_i32, %c0_i32_0 : i32, i32, i32
  }
  func.func @transform_5(%arg0: i32, %arg1: i32) -> (i32, i32, i32) {
    %c0_i32 = arith.constant 0 : i32
    %c0_i32_0 = arith.constant 0 : i32
    %c0_i32_1 = arith.constant 0 : i32
    return %arg1, %c0_i32, %c0_i32_0 : i32, i32, i32
  }
  func.func @transform_6(%arg0: i32, %arg1: i32) -> (i32, i32, i32) {
    %c0_i32 = arith.constant 0 : i32
    %c0_i32_0 = arith.constant 0 : i32
    %c0_i32_1 = arith.constant 0 : i32
    return %arg1, %c0_i32, %c0_i32_0 : i32, i32, i32
  }
  func.func @transform_7(%arg0: i32, %arg1: i32) -> (i32, i32, i32) {
    %c0_i32 = arith.constant 0 : i32
    %c0_i32_0 = arith.constant 0 : i32
    %c0_i32_1 = arith.constant 0 : i32
    return %arg1, %c0_i32, %c0_i32_0 : i32, i32, i32
  }
  func.func @transform_8(%arg0: i32, %arg1: i32) -> (i32, i32, i32) {
    %c0_i32 = arith.constant 0 : i32
    %c0_i32_0 = arith.constant 0 : i32
    %c0_i32_1 = arith.constant 0 : i32
    return %arg1, %c0_i32, %c0_i32_0 : i32, i32, i32
  }
  func.func @transform_9(%arg0: i32, %arg1: i32) -> (i32, i32, i32) {
    %c0_i32 = arith.constant 0 : i32
    %c0_i32_0 = arith.constant 0 : i32
    %c0_i32_1 = arith.constant 0 : i32
    return %arg1, %c0_i32, %c0_i32_0 : i32, i32, i32
  }
  func.func @transform_10(%arg0: i32, %arg1: i32) -> (i32, i32) {
    %c0_i32 = arith.constant 0 : i32
    %c0_i32_0 = arith.constant 0 : i32
    %c0_i32_1 = arith.constant 0 : i32
    return %c0_i32, %c0_i32_0 : i32, i32
  }
  func.func @transform_11(%arg0: i32, %arg1: i32) -> (i32, i32) {
    %c0_i32 = arith.constant 0 : i32
    %c0_i32_0 = arith.constant 0 : i32
    %c0_i32_1 = arith.constant 0 : i32
    return %c0_i32, %c0_i32_0 : i32, i32
  }
  func.func @transform_12(%arg0: i32, %arg1: i32) -> (i32, i32) {
    %c0_i32 = arith.constant 0 : i32
    %c0_i32_0 = arith.constant 0 : i32
    return %arg0, %c0_i32 : i32, i32
  }
}

</mosaic_0001>

<bundles_post_ra>
// kernel: tpu_custom_call.1
= control target key start
LH: loop header
LB: loop body
LE: loop exit
PB: predicated region body
PF: predicated region fallthrough
CT: control target
= control target key end

     0   :  { %s3777_s0 = inlined_call_operand.vmem [shape: f32[16,4], index: 0, kind: input, shape index: {}]   ;;  %s3778_s1 = inlined_call_operand.hbm [shape: f32[4,32], index: 1, kind: input, shape index: {}]   ;;  %s3779_s2 = inlined_call_operand.vmem [shape: f32[16,32], index: 2, kind: input, shape index: {}]   ;;  %s3780_s3 = inlined_call_operand.vmem [shape: f32[2,32,96], index: 3, kind: input, shape index: {}]   ;;  %s3781_s4 = inlined_call_operand.vmem [shape: f32[2,1,96], index: 4, kind: input, shape index: {}]   ;;  %s3782_s5 = inlined_call_operand.vmem [shape: f32[2,32,32], index: 5, kind: input, shape index: {}]   ;;  %s3783_s6 = inlined_call_operand.vmem [shape: f32[2,32,64], index: 6, kind: input, shape index: {}]   ;;  %s3784_s7 = inlined_call_operand.hbm [shape: f32[2,1,64], index: 7, kind: input, shape index: {}]   ;;  %s3785_s8 = inlined_call_operand.vmem [shape: f32[2,64,32], index: 8, kind: input, shape index: {}]   ;;  %s3786_s9 = inlined_call_operand.vmem [shape: f32[2,6,32], index: 9, kind: input, shape index: {}]   ;;  %s3787_s10 = inlined_call_operand.vmem [shape: f32[1,32], index: 10, kind: input, shape index: {}]   ;;  %s3788_s11 = inlined_call_operand.<no memory space> [shape: f32[1,1], index: 11, kind: input, shape index: {}]   ;;  %s3789_s12 = inlined_call_operand.vmem [shape: f32[2,1], index: 12, kind: output, shape index: {}]  }
   0x1   :  { %3796 = sst [smem:[#allocation14_spill]] %s3778_s1  ;;  %v17_v0 = vstv %s3788_s11 }
   0x2   :  { %3797 = sst [smem:[#allocation15_spill]] %s3784_s7  ;;  %18 = vst [vmem:[#allocation4] sm:$0x1] %v17_v0 }
   0x3   :  { %3798 = sst [smem:[#allocation16_spill]] %s3789_s12 }
   0x4   :  { %19 = vsyncpa [#allocation6], 0 }
   0x5   :  { %20 = vsyncpa [#allocation8], 0 }
   0x6   :  { %22 = vsyncpa [#allocation8 + $0x1], 0  ;;  %s3360_s23 = smov 0   ;;  %s3362_s24 = smov 0  }
   0x7   :  { %s3364_s25 = smov 0   ;;  %s3366_s26 = smov 0  }
   0x8   :  { %s3368_s27 = smov 0   ;;  %s3370_s28 = smov 0  }
   0x9 LB: > { %3799 = sst [smem:[#allocation11_spill]] %s3264_s27  ;;  %s2723_s11 = sadd.s32 4294967295, %s3268_s28   ;;  %s3268_s28 = sphi %s3370_s28, %s28_s28   ;;  %s3264_s27 = sphi %s3368_s27, %s3819_s27   ;;  %s3260_s26 = sphi %s3366_s26, %s3818_s26   ;;  %s3256_s25 = sphi %s3364_s25, %s3822_s25   ;;  %s3252_s24 = sphi %s3362_s24, %s3821_s24   ;;  %s3248_s23 = sphi %s3360_s23, %s3820_s23  }
   0xa   : > { %p237_p0 = scmp.ne.s32.totalorder %s3252_s24, %s3248_s23  ;;  %p3390_p1 = scmp.eq.s32.totalorder %s2723_s11, 0 }
   0xb   : > { %p2724_p2 = scmp.ge.s32.totalorder %s3268_s28, 1  ;;  %p368_p3 = scmp.lt.s32.totalorder %s3268_s28, 3 }
   0xc   : > { %s3800_s29 = scalar_select %p3390_p1, 1, 0 }
   0xd   : > { %p3398_p4 = por %p3390_p1, %p237_p0  ;;  %p3402_p5 = pnand %p2724_p2, %p368_p3 }
   0xe   : > { %s3270_s14 = smov [#allocation5]   ;;  %s37_s17 = sadd.s32 1, %s3264_s27 }
   0xf   : > { %s3801_s30 = scalar_select %p3398_p4, 1, 0 }
  0x10   : > { %s3802_s13 = scalar_select %p3402_p5, 1, 0 }
  0x11   : > { %s390_s15 = sshll.u32 %s3270_s14, 4  ;;  %p3030_p6 = pneg %p3402_p5  ;;  %s391_s15 = int_to_ptr.vmem [resolvable:$true] %s390_s15 }
  0x12   : > { %p3416_p8 = scmp.ge.s32.totalorder %s37_s17, 2  ;;  %s3805_s1 = sld [smem:[#allocation14_spill]] }
  0x13   : > { %p3410_p7 = pnand %p3030_p6, %p3390_p1 }
  0x14   : > { %s3804_s19 = scalar_select %p3416_p8, 1, 0 }
  0x15   : > { %p3158_p10 = pneg %p3410_p7 }
  0x18   : > { %s3156_s22 = scalar_lea.hbm %s3805_s1, 64 }
  0x19   : > { %p3157_p9 = scmp.ne.s32.totalorder %s3805_s1, %s3156_s22  ;;  %p3163_p13 = scmp.lt.u32.totalorder %s3156_s22, %s3805_s1 }
  0x1b   : > { %p3159_p11 = pnand %p3158_p10, %p3157_p9 }
  0x1d   : > { %p3160_p12 = pneg %p3159_p11 }
  0x1f   : > { %p3165_p0 = pnand %p3163_p13, %p3160_p12 }
  0x21   : > { %3168 = shalt.err (!%p3165_p0)
}
  0x22   : > { %s3169_s18 = scalar_lea.vmem %s391_s15, 64  ;;  %p3177_p4 = scmp.lt.s32.totalorder %s391_s15, %s391_s15 }
  0x23   : > { %p3170_p2 = scmp.ne.s32.totalorder %s391_s15, %s3169_s18  ;;  %p3178_p1 = scmp.lt.s32.totalorder %s3169_s18, %s3169_s18 }
  0x25   : > { %p3172_p3 = pnand %p3170_p2, %p3158_p10  ;;  %p3179_p5 = por %p3178_p1, %p3177_p4 }
  0x27   : > { %p3173_p6 = pneg %p3172_p3 }
  0x29   : > { %p3180_p8 = pnand %p3179_p5, %p3173_p6 }
  0x2b   : > { %3183 = shalt.err (!%p3180_p8)
}
  0x2c   : > { %3033 = dma.hbm_to_vmem [thread:$0]  (!%p3410_p7), %s3805_s1, 64, %s391_s15, [#allocation6]  }
  0x2d   : > { %p3806_p9 = scmp.ne.s32.totalorder %s3804_s19, 0  ;;  %p231_p1 = scmp.ne.s32.totalorder %s3256_s25, %s3252_s24 }
  0x2e   : > { %p232_p4 = scmp.eq.s32.totalorder %s3268_s28, 0  ;;  %p3039_p5 = scmp.lt.s32.totalorder %s3268_s28, 2 }
  0x2f   : > { %s3824_s17 = smov (%p3806_p9, %s37_s17), 0  ;;  %s446_s16 = sand.u32 1, %s3256_s25  }
  0x30   : > { %3807 = sst [smem:[#allocation12_spill]] %s3824_s17  ;;  %s221_s12 = ssub.s32 %s3264_s27, %s3824_s17 }
  0x31   : > { %p222_p8 = scmp.eq.s32.totalorder %s221_s12, 0  ;;  %p233_p10 = por %p232_p4, %p231_p1 }
  0x32   : > { %s2729_s18 = sshll.u32 %s3264_s27, 4  ;;  %s3808_s22 = sadd.s32 1, %s3256_s25 }
  0x33   : > { %s3451_s23 = scalar_select %p222_p8, %s3256_s25, %s3808_s22  }
  0x34   : > { %s3810_s7 = sld [smem:[#allocation15_spill]]  ;;  %s449_s15 = scalar_lea.vmem [#allocation7], %s446_s16 }
  0x35   : > { %3809 = sst [smem:[#allocation13_spill]] %s3451_s23  ;;  %s456_s19 = sshll.u32 %s449_s15, 4  ;;  %s3458_s19 = int_to_ptr.vmem [resolvable:$true] %s456_s19 }
  0x36   : > { %p3460_p7 = pnand %p3039_p5, %p233_p10  ;;  %s447_s12 = scalar_lea.sflag [#allocation8], %s446_s16 }
  0x38   : > { %p3186_p12 = pneg %p3460_p7 }
  0x3a   : > { %s3456_s20 = scalar_lea.hbm %s3810_s7, %s2729_s18  ;;  %s3189_s14 = scalar_lea.hbm %s3810_s7, 32 }
  0x3b   : > { %s3184_s22 = scalar_lea.hbm %s3456_s20, 16  ;;  %p3190_p2 = scmp.lt.u32.totalorder %s3456_s20, %s3810_s7 }
  0x3c   : > { %p3185_p11 = scmp.ne.s32.totalorder %s3456_s20, %s3184_s22  ;;  %p3191_p3 = scmp.lt.u32.totalorder %s3189_s14, %s3184_s22 }
  0x3d   : > { %p3193_p9 = scmp.lt.u32.totalorder %s3184_s22, %s3456_s20 }
  0x3e   : > { %p3187_p13 = pnand %p3186_p12, %p3185_p11  ;;  %p3192_p6 = por %p3191_p3, %p3190_p2 }
  0x40   : > { %p3188_p0 = pneg %p3187_p13  ;;  %p3194_p1 = por %p3193_p9, %p3192_p6 }
  0x42   : > { %p3195_p4 = pnand %p3194_p1, %p3188_p0 }
  0x44   : > { %3198 = shalt.err (!%p3195_p4)
}
  0x45   : > { %s3199_s16 = scalar_lea.vmem %s3458_s19, 16  ;;  %s3271_s18 = smov [#allocation7]  }
  0x46   : > { %p3200_p5 = scmp.ne.s32.totalorder %s3458_s19, %s3199_s16  ;;  %s3204_s11 = sshll.u32 %s3271_s18, 4  ;;  %s3205_s11 = int_to_ptr.vmem [resolvable:$false] %s3204_s11 }
  0x47   : > { %s3206_s1 = scalar_lea.vmem %s3205_s11, 32  ;;  %p3207_p11 = scmp.lt.s32.totalorder %s3458_s19, %s3205_s11 }
  0x48   : > { %p3202_p8 = pnand %p3200_p5, %p3186_p12  ;;  %p3208_p13 = scmp.lt.s32.totalorder %s3206_s1, %s3199_s16 }
  0x4a   : > { %p3203_p10 = pneg %p3202_p8  ;;  %p3209_p2 = por %p3208_p13, %p3207_p11 }
  0x4c   : > { %p3210_p3 = pnand %p3209_p2, %p3203_p10 }
  0x4e   : > { %3213 = shalt.err (!%p3210_p3)
}
  0x4f   : > { %3037 = dma.hbm_to_vmem [thread:$0]  (!%p3460_p7), %s3456_s20, 16, %s3458_s19, %s447_s12  }
  0x50   : > { %p3812_p0 = scmp.ne.s32.totalorder %s3802_s13, 0 }
  0x51   : > { %p3813_p12 = scmp.ne.s32.totalorder (!%p3812_p0), %s3800_s29, 0 }
  0x52   : > { %480 = sbr.rel (%p3812_p0) target bundleno = 2957 (0xb8d), region = 68 }
  0x59   : > { %3239 = dma.done.wait (%p3813_p12), [#allocation6], 64  }
  0x5a   : > { %3241 = vsyncadd (%p3813_p12), [#allocation6], 4294967232  ;;  %s486_s22 = sand.u32 1, %s3252_s24   ;;  %p3814_p6 = scmp.ne.s32.totalorder %s3801_s30, 0 }
  0x5b   : > { %s487_s14 = scalar_lea.sflag [#allocation8], %s486_s22  ;;  %s3496_s15 = scalar_lea.vmem [#allocation7], %s486_s22 }
  0x5c   : > { %3243 = dma.done.wait (%p3814_p6), %s487_s14, 16  }
  0x5d   : > { %3245 = vsyncadd (%p3814_p6), %s487_s14, 4294967280  ;;  %p577_p7 = scmp.lt.s32.totalorder %s3260_s26, 1  ;;  %p2741_p9 = scmp.ne.s32.totalorder %s3260_s26, 0 }
  0x5e   : > { %v612_v1 = vld [vmem:[%s3777_s0] sm:$0xff] (!%p2741_p9)  ;;  %v3272_v2 = vmov (!%p2741_p9), 1   ;;  %v3273_v3 = vmov (!%p2741_p9), 0   ;;  %v613_v4 = vld [vmem:[%s3777_s0 + $0x8] sm:$0xff] (!%p2741_p9)  ;;  %v3274_v5 = vmov (!%p2741_p9), 2   ;;  %v3275_v6 = vmov (!%p2741_p9), 3  }
  0x5f   : > { %s3504_s13 = scalar_select %p577_p7, %s3260_s26, 1 }
  0x60   : > { %611 = sbr.rel (%p2741_p9) target bundleno = 244 (0xf4), region = 80  ;;  %3111 = vset.pattern.permute.xlu1 (!%p2741_p9), %v3272_v2  ;;  %3110 = vset.pattern.permute.xlu0 (!%p2741_p9), %v3273_v3  ;;  %v627_v7 = vlaneseq (!%p2741_p9)  ;;  %v614_v10 = vld [vmem:[#allocation5] sm:$0xf] (!%p2741_p9)  ;;  %v616_v17 = vld [vmem:[%s3779_s2 + $0x8] sm:$0xff] (!%p2741_p9)  ;;  %vm683_vm0 = vcmask (!%p2741_p9), 261120  }
  0x61   : > { %s2788_s29 = sshll.u32 %s3504_s13, 5  ;;  %s2791_s17 = sshll.u32 %s3504_s13, 6  ;;  %636 = vperm.xlu1 (!%p2741_p9), %3111, %v612_v1   ;;  %619 = vperm.xlu0 (!%p2741_p9), %3110, %v612_v1   ;;  %v615_v21 = vld [vmem:[%s3779_s2] sm:$0xff] (!%p2741_p9) }
  0x62   : > { %s3514_s18 = scalar_lea.vmem %s3780_s3, %s2788_s29  ;;  %s3519_s1 = scalar_lea.vmem %s3782_s5, %s2788_s29  ;;  %v628_v8 = vshrl.u32 (!%p2741_p9), %v627_v7, 7 }
  0x63   : > { %s3524_s7 = scalar_lea.vmem %s3783_s6, %s2788_s29  ;;  %s3530_s20 = scalar_lea.vmem %s3785_s8, %s2791_s17 }
  0x64   : > { %s2740_s19 = sshll.u32 %s3504_s13, 3  ;;  %v629_v9 = vsub.s32 (!%p2741_p9), 0, %v628_v8  ;;  %v645_v14 = vsub.s32 (!%p2741_p9), 1, %v628_v8  ;;  %v661_v15 = vsub.s32 (!%p2741_p9), 2, %v628_v8  ;;  %v677_v22 = vsub.s32 (!%p2741_p9), 3, %v628_v8 }
  0x65   : > { %s3536_s21 = scalar_lea.vmem %s3786_s9, %s2740_s19  ;;  %640 = vperm.xlu1 (!%p2741_p9), %3111, %v613_v4   ;;  %624 = vperm.xlu0 (!%p2741_p9), %3110, %v613_v4  }
  0x66   : > { %v630_v13 = vrot.slane (!%p2741_p9), %v614_v10, %v629_v9  ;;  %v646_v23 = vrot.slane (!%p2741_p9), %v614_v10, %v645_v14  ;;  %v662_v25 = vrot.slane (!%p2741_p9), %v614_v10, %v661_v15  ;;  %v678_v30 = vrot.slane (!%p2741_p9), %v614_v10, %v677_v22 }
  0x69   : > { %3113 = vset.pattern.permute.xlu1 %v3274_v5  ;;  %3112 = vset.pattern.permute.xlu0 %v3274_v5 }
  0x6a   : > { %656 = vperm.xlu1 %3113, %v613_v4   ;;  %652 = vperm.xlu0 %3112, %v612_v1  }
  0x6e   : > { %3114 = vset.pattern.permute.xlu1 %v3275_v6  ;;  %3115 = vset.pattern.permute.xlu0 %v3275_v6 }
  0x6f   : > { %668 = vperm.xlu1 %3114, %v612_v1   ;;  %672 = vperm.xlu0 %3115, %v613_v4  }
  0xe0   : > { %v637_v11 = vpop.permute.xlu1 %636  ;;  %v620_v12 = vpop.permute.xlu0 %619 }
  0xe1   : > { %v631_v19 = vmul.f32 %v630_v13, %v620_v12  ;;  %v647_v31 = vmul.f32 %v646_v23, %v637_v11 }
  0xe3   : > { %v633_v26 = vadd.f32 %v631_v19, %v615_v21 }
  0xe4   : > { %v641_v16 = vpop.permute.xlu1 %640  ;;  %v625_v18 = vpop.permute.xlu0 %624 }
  0xe5   : > { %v632_v20 = vmul.f32 %v630_v13, %v625_v18  ;;  %v648_v27 = vmul.f32 %v646_v23, %v641_v16  ;;  %v649_v35 = vadd.f32 %v647_v31, %v633_v26 }
  0xe7   : > { %v634_v24 = vadd.f32 %v632_v20, %v616_v17 }
  0xe9   : > { %v657_v28 = vpop.permute.xlu1 %656  ;;  %v653_v29 = vpop.permute.xlu0 %652  ;;  %v650_v32 = vadd.f32 %v648_v27, %v634_v24 }
  0xea   : > { %v664_v33 = vmul.f32 %v662_v25, %v657_v28  ;;  %v663_v34 = vmul.f32 %v662_v25, %v653_v29 }
  0xec   : > { %v666_v38 = vadd.f32 %v664_v33, %v650_v32  ;;  %v665_v39 = vadd.f32 %v663_v34, %v649_v35 }
  0xee   : > { %v669_v36 = vpop.permute.xlu1 %668  ;;  %v673_v37 = vpop.permute.xlu0 %672 }
  0xef   : > { %v679_v40 = vmul.f32 %v678_v30, %v669_v36  ;;  %v680_v41 = vmul.f32 %v678_v30, %v673_v37 }
  0xf1   : > { %v681_v42 = vadd.f32 %v679_v40, %v665_v39  ;;  %v682_v43 = vadd.f32 %v680_v41, %v666_v38 }
  0xf3   : > { %684 = vst.msk [vmem:[#allocation2] sm:$0xff] %vm683_vm0, %v681_v42  ;;  %685 = vst.msk [vmem:[#allocation2 + $0x8] sm:$0xff] %vm683_vm0, %v682_v43 }
  0xf4 PF: > { %v688_v44 = vld [vmem:[%s3514_s18] sm:$0xff]  ;;  %v689_v45 = vld [vmem:[%s3514_s18 + $0x8] sm:$0xff]  ;;  %v690_v46 = vld [vmem:[%s3514_s18 + $0x10] sm:$0xff]  ;;  %vm699_vm1 = vcmask 261120   ;;  %v3276_v52 = vmov 0.0   ;;  %vm3277_vm2 = vmmov 0   ;;  %s3815_s12 = scalar_lea.vmem %s3781_s4, %s3504_s13 }
  0xf5   : > { %v2984_v47 = vpack.c.bf16 %v689_v45, %v688_v44  ;;  %v691_v48 = vld [vmem:[%s3514_s18 + $0x18] sm:$0xff]  ;;  %2873 = vmatprep.subr.mxu0 %v3276_v52  ;;  %2875 = vmatprep.mubr.msk.f32.mxu0 %vm3277_vm2, %v3276_v52  ;;  %v2742_v53 = vld [vmem:[%s3815_s12] ss:$0 sm:$0xff]  ;;  %s3278_s16 = smov 120   ;;  %s3279_s30 = smov 96   ;;  %vm784_vm3 = vcmask 64512  }
  0xf6   : > { %v2988_v50 = vpack.c.bf16 %v691_v48, %v690_v46  ;;  %s3280_s11 = smov 80   ;;  %s3281_s27 = smov 88   ;;  %vm1118_vm4 = vcmask 130112   ;;  %vm1290_vm5 = vcmask 195712   ;;  %vm1462_vm6 = vcmask 261312  }
  0xf7   : > { %2985 = vmatprep.subr.bf16.mxu1 %v2984_v47  ;;  %s3282_s17 = smov 72   ;;  %s3283_s13 = smov 112   ;;  %vm2385_vm7 = vcmask 523264  }
  0xf8   : > { %2987 = vmatpush3.bf16.msra.mxu1 %v2984_v47  ;;  %s3284_s23 = smov 104   ;;  %s3285_s29 = smov 56  }
  0xf9   : > { %2989 = vmatprep.subr.bf16.mxu1 %v2988_v50  ;;  %s3286_s22 = smov 64   ;;  %s3287_s14 = smov 40  }
  0xfa   : > { %v3555_v49 = vld [vmem:[#allocation2] sm:$0xff]  ;;  %v3559_v51 = vld [vmem:[#allocation2 + $0x8] sm:$0xff]  ;;  %s3288_s18 = smov 48   ;;  %s3289_s19 = smov 8  }
  0xfb   : > { %2860 = vmatprep.mubr.msk.f32.mxu1 %vm699_vm1, %v3555_v49  ;;  %s3290_s12 = smov 16   ;;  %p2782_p1 = scmp.ne.s32.totalorder %s3260_s26, 1 }
  0xfc   : > { %2991 = vmatpush3.bf16.msra.mxu1 %v2988_v50  ;;  %vm2521_vm8 = vcmask (!%p2782_p1), 1040384   ;;  %vm2531_vm9 = vcmask (!%p2782_p1), 254976   ;;  %vm2543_vm10 = vcmask (!%p2782_p1), 1024   ;;  %s3816_s26 = sld [smem:[#allocation16_spill]] (!%p2782_p1) }
  0xfd   : > { %2863 = vmatprep.subr.mxu1 %v3276_v52 }
  0xff   : > { %2861 = vmatmul.mubr.msk.f32.vlgmr.msra.gmra.mrb[0].mxu1 %vm699_vm1, %v3559_v51 }
 0x100   : > { %2865 = vmatprep.mubr.msk.f32.mxu1 %vm3277_vm2, %v3276_v52 }
 0x1d2   : > { %v2862_v54 = vpop.f32.mrb[0].mxu1 }
 0x1d3   : > { %v772_v55 = vpop.f32.mrb[1].mxu1  ;;  %v3582_v57 = vadd.f32 %v2862_v54, %v2742_v53 }
 0x1d4   : > { %v3574_v56 = vadd.f32 %v2742_v53, %v772_v55 }
 0x1d6   : > { %948 = vrot.lane.b32.xlu1 %v3574_v56, %s3278_s16  ;;  %782 = vrot.lane.b32.xlu0 %v3574_v56, %s3279_s30 }
 0x1da   : > { %1122 = vrot.lane.b32.xlu1 %v3574_v56, %s3280_s11  ;;  %950 = vrot.lane.b32.xlu0 %v3574_v56, %s3281_s27 }
 0x1de   : > { %1294 = vrot.lane.b32.xlu1 %v3574_v56, %s3282_s17  ;;  %1120 = vrot.lane.b32.xlu0 %v3574_v56, %s3283_s13 }
 0x1e2   : > { %1465 = vrot.lane.b32.xlu1 %v3582_v57, %s3279_s30  ;;  %1292 = vrot.lane.b32.xlu0 %v3574_v56, %s3284_s23 }
 0x1e6   : > { %1630 = vrot.lane.b32.xlu1 %v3582_v57, %s3278_s16  ;;  %1632 = vrot.lane.b32.xlu0 %v3582_v57, %s3281_s27  ;;  %s3291_s16 = smov 24  }
 0x1ea   : > { %1801 = vrot.lane.b32.xlu1 %v3582_v57, %s3283_s13  ;;  %1803 = vrot.lane.b32.xlu0 %v3582_v57, %s3280_s11 }
 0x1ee   : > { %1972 = vrot.lane.b32.xlu1 %v3582_v57, %s3284_s23  ;;  %1974 = vrot.lane.b32.xlu0 %v3582_v57, %s3282_s17 }
 0x1f2   : > { %1038 = vrot.lane.b32.xlu1 %v3574_v56, %s3285_s29  ;;  %871 = vrot.lane.b32.xlu0 %v3574_v56, %s3286_s22 }
 0x248   : > { %v949_v58 = vpop.permute.xlu1 %948  ;;  %v783_v59 = vpop.permute.xlu0 %782 }
 0x249   : > { %2864 = vmatpush3.xpose.msk.msra.mxu1 %vm784_vm3, %v783_v59 }
 0x24a   : > { %2868 = vmatprep.subr.mxu1 %v3276_v52 }
 0x24c   : > { %v1123_v60 = vpop.permute.xlu1 %1122  ;;  %2866 = vmatmul.mubr.msk.f32.vlgmr.msra.gmra.mrb[2].mxu1 %vm784_vm3, %v3574_v56  ;;  %v951_v61 = vpop.permute.xlu0 %950 }
 0x24d   : > { %2874 = vmatpush3.xpose.msk.msra.mxu0 %vm784_vm3, %v951_v61  ;;  %2870 = vmatprep.mubr.msk.f32.mxu1 %vm3277_vm2, %v3276_v52 }
 0x24e   : > { %2883 = vmatprep.subr.mxu0 %v3276_v52 }
 0x250   : > { %v1295_v62 = vpop.permute.xlu1 %1294  ;;  %2876 = vmatmul.mubr.msk.f32.vlgmr.msra.gmra.mrb[0].mxu0 %vm784_vm3, %v949_v58  ;;  %v1121_v63 = vpop.permute.xlu0 %1120 }
 0x251   : > { %2884 = vmatpush3.xpose.msk.msra.mxu0 %vm784_vm3, %v1123_v60  ;;  %2885 = vmatprep.mubr.msk.f32.mxu0 %vm3277_vm2, %v3276_v52 }
 0x252   : > { %2893 = vmatprep.subr.mxu0 %v3276_v52 }
 0x254   : > { %2886 = vmatmul.mubr.msk.f32.vlgmr.msra.gmra.mrb[2].mxu0 %vm784_vm3, %v1121_v63  ;;  %v1293_v0 = vpop.permute.xlu0 %1292  ;;  %v1466_v1 = vpop.permute.xlu1 %1465 }
 0x255   : > { %2894 = vmatpush3.xpose.msk.msra.mxu0 %vm784_vm3, %v1295_v62  ;;  %2895 = vmatprep.mubr.msk.f32.mxu0 %vm3277_vm2, %v3276_v52 }
 0x256   : > { %2903 = vmatprep.subr.mxu0 %v3276_v52 }
 0x258   : > { %2896 = vmatmul.mubr.msk.f32.vlgmr.msra.gmra.mrb[4].mxu0 %vm784_vm3, %v1293_v0  ;;  %v1633_v2 = vpop.permute.xlu0 %1632  ;;  %v1631_v3 = vpop.permute.xlu1 %1630 }
 0x259   : > { %2904 = vmatpush3.xpose.msk.msra.mxu0 %vm784_vm3, %v1466_v1  ;;  %2905 = vmatprep.mubr.msk.f32.mxu0 %vm3277_vm2, %v3276_v52 }
 0x25a   : > { %2913 = vmatprep.subr.mxu0 %v3276_v52 }
 0x25c   : > { %2906 = vmatmul.mubr.msk.f32.vlgmr.msra.gmra.mrb[6].mxu0 %vm784_vm3, %v3582_v57  ;;  %v1804_v4 = vpop.permute.xlu0 %1803  ;;  %v1802_v6 = vpop.permute.xlu1 %1801 }
 0x25d   : > { %2914 = vmatpush3.xpose.msk.msra.mxu0 %vm784_vm3, %v1633_v2  ;;  %2915 = vmatprep.mubr.msk.f32.mxu0 %vm3277_vm2, %v3276_v52 }
 0x25e   : > { %2923 = vmatprep.subr.mxu0 %v3276_v52 }
 0x260   : > { %2916 = vmatmul.mubr.msk.f32.vlgmr.msra.gmra.mrb[8].mxu0 %vm784_vm3, %v1631_v3  ;;  %v1975_v5 = vpop.permute.xlu0 %1974  ;;  %v1973_v8 = vpop.permute.xlu1 %1972 }
 0x261   : > { %2924 = vmatpush3.xpose.msk.msra.mxu0 %vm784_vm3, %v1804_v4  ;;  %2925 = vmatprep.mubr.msk.f32.mxu0 %vm3277_vm2, %v3276_v52 }
 0x262   : > { %2933 = vmatprep.subr.mxu0 %v3276_v52 }
 0x264   : > { %2926 = vmatmul.mubr.msk.f32.vlgmr.msra.gmra.mrb[10].mxu0 %vm784_vm3, %v1802_v6  ;;  %v872_v7 = vpop.permute.xlu0 %871  ;;  %v3648_v41 = vpop.permute.xlu1 %1038 }
 0x265   : > { %2869 = vmatpush3.msra.mxu1 %v872_v7  ;;  %2934 = vmatpush3.xpose.msk.msra.mxu0 %vm784_vm3, %v1975_v5 }
 0x266   : > { %2935 = vmatprep.mubr.msk.f32.mxu0 %vm3277_vm2, %v3276_v52  ;;  %2878 = vmatprep.subr.mxu1 %v3276_v52 }
 0x268   : > { %2936 = vmatmul.mubr.msk.f32.vlgmr.msra.gmra.mrb[12].mxu0 %vm784_vm3, %v1973_v8 }
 0x31f   : > { %v855_v9 = vpop.f32.mrb[2].mxu1 }
 0x320   : > { %v859_v10 = vmul.f32 0.35355338, %v855_v9  ;;  %v2867_v11 = vpop.f32.mrb[3].mxu1 }
 0x322   : > { %v860_v12 = vsel %vm784_vm3, %v859_v10, -inf }
 0x323   : > { %861 = vmax.xlane.f32.xlu0 %v860_v12  ;;  %v1022_v13 = vpop.f32.mrb[0].mxu0 }
 0x324   : > { %v1026_v14 = vmul.f32 0.35355338, %v1022_v13  ;;  %v2877_v15 = vpop.f32.mrb[1].mxu0 }
 0x326   : > { %v1027_v16 = vsel %vm784_vm3, %v1026_v14, -inf }
 0x327   : > { %1028 = vmax.xlane.f32.xlu1 %v1027_v16  ;;  %v1194_v17 = vpop.f32.mrb[2].mxu0 }
 0x328   : > { %v1198_v18 = vmul.f32 0.35355338, %v1194_v17  ;;  %v2887_v19 = vpop.f32.mrb[3].mxu0 }
 0x32a   : > { %v1199_v20 = vsel %vm784_vm3, %v1198_v18, -inf }
 0x32b   : > { %1200 = vmax.xlane.f32.xlu0 %v1199_v20  ;;  %v1366_v21 = vpop.f32.mrb[4].mxu0 }
 0x32c   : > { %v1370_v22 = vmul.f32 0.35355338, %v1366_v21  ;;  %v2897_v23 = vpop.f32.mrb[5].mxu0 }
 0x32e   : > { %v1371_v24 = vsel %vm784_vm3, %v1370_v22, -inf }
 0x32f   : > { %1372 = vmax.xlane.f32.xlu0 %v1371_v24  ;;  %v1537_v25 = vpop.f32.mrb[6].mxu0 }
 0x330   : > { %v1541_v26 = vmul.f32 0.35355338, %v1537_v25  ;;  %v2907_v27 = vpop.f32.mrb[7].mxu0 }
 0x332   : > { %v1542_v28 = vsel %vm784_vm3, %v1541_v26, -inf }
 0x333   : > { %1543 = vmax.xlane.f32.xlu1 %v1542_v28  ;;  %v1704_v29 = vpop.f32.mrb[8].mxu0 }
 0x334   : > { %v1708_v30 = vmul.f32 0.35355338, %v1704_v29  ;;  %v2917_v31 = vpop.f32.mrb[9].mxu0 }
 0x336   : > { %v1709_v32 = vsel %vm784_vm3, %v1708_v30, -inf }
 0x337   : > { %1710 = vmax.xlane.f32.xlu0 %v1709_v32  ;;  %v1875_v33 = vpop.f32.mrb[10].mxu0 }
 0x338   : > { %v1879_v34 = vmul.f32 0.35355338, %v1875_v33  ;;  %v2927_v35 = vpop.f32.mrb[11].mxu0 }
 0x33a   : > { %v1880_v36 = vsel %vm784_vm3, %v1879_v34, -inf }
 0x33b   : > { %1881 = vmax.xlane.f32.xlu1 %v1880_v36  ;;  %v2046_v37 = vpop.f32.mrb[12].mxu0 }
 0x33c   : > { %v2050_v38 = vmul.f32 0.35355338, %v2046_v37  ;;  %v2937_v39 = vpop.f32.mrb[13].mxu0 }
 0x33e   : > { %v2051_v40 = vsel %vm784_vm3, %v2050_v38, -inf }
 0x33f   : > { %2052 = vmax.xlane.f32.xlu0 %v2051_v40 }
 0x34c   : > { %1382 = vrot.lane.b32.xlu1 %v3574_v56, %s3287_s14 }
 0x355   : > { %1210 = vrot.lane.b32.xlu0 %v3574_v56, %s3288_s18 }
 0x3b0   : > { %v862_v42 = vpop.xlane.xlu0 %861 }
 0x3b1   : > { %v863_v43 = vsub.f32 %v859_v10, %v862_v42 }
 0x3b3   : > { %v864_v44 = vmul.f32 1.442695, %v863_v43 }
 0x3b4   : > { %v1029_v45 = vpop.xlane.xlu1 %1028 }
 0x3b5   : > { %3116 = vpow2.f32 %v864_v44  ;;  %v1030_v46 = vsub.f32 %v1026_v14, %v1029_v45 }
 0x3b7   : > { %v1031_v47 = vmul.f32 1.442695, %v1030_v46 }
 0x3b8   : > { %v1201_v48 = vpop.xlane.xlu0 %1200 }
 0x3b9   : > { %3118 = vpow2.f32 %v1031_v47  ;;  %v1202_v50 = vsub.f32 %v1198_v18, %v1201_v48 }
 0x3bb   : > { %v1203_v53 = vmul.f32 1.442695, %v1202_v50 }
 0x3bc   : > { %v1373_v54 = vpop.xlane.xlu0 %1372 }
 0x3bd   : > { %3120 = vpow2.f32 %v1203_v53  ;;  %v1374_v55 = vsub.f32 %v1370_v22, %v1373_v54 }
 0x3bf   : > { %v3117_v58 = vpop.eup %3116  ;;  %v1375_v59 = vmul.f32 1.442695, %v1374_v55 }
 0x3c0   : > { %v866_v56 = vsel %vm784_vm3, %v3117_v58, 0.0  ;;  %v1544_v2 = vpop.xlane.xlu1 %1543 }
 0x3c1   : > { %3122 = vpow2.f32 %v1375_v59  ;;  %867 = vadd.xlane.f32.xlu1 %v866_v56  ;;  %v1545_v3 = vsub.f32 %v1541_v26, %v1544_v2 }
 0x3c3   : > { %v3119_v60 = vpop.eup %3118  ;;  %v1546_v7 = vmul.f32 1.442695, %v1545_v3  ;;  %v2147_v3 = vld [vmem:[%s3519_s1 + $0x10] sm:$0xff] }
 0x3c4   : > { %v1033_v61 = vsel %vm784_vm3, %v3119_v60, 0.0  ;;  %v1711_v4 = vpop.xlane.xlu0 %1710 }
 0x3c5   : > { %1034 = vadd.xlane.f32.xlu0 %v1033_v61  ;;  %v1712_v6 = vsub.f32 %v1708_v30, %v1711_v4  ;;  %3124 = vpow2.f32 %v1546_v7  ;;  %v2148_v4 = vld [vmem:[%s3519_s1 + $0x18] sm:$0xff] }
 0x3c7   : > { %v3121_v62 = vpop.eup %3120  ;;  %v1713_v10 = vmul.f32 1.442695, %v1712_v6 }
 0x3c8   : > { %v1205_v63 = vsel %vm784_vm3, %v3121_v62, 0.0  ;;  %v1882_v5 = vpop.xlane.xlu1 %1881 }
 0x3c9   : > { %1206 = vadd.xlane.f32.xlu1 %v1205_v63  ;;  %v1883_v8 = vsub.f32 %v1879_v34, %v1882_v5  ;;  %3126 = vpow2.f32 %v1713_v10  ;;  %v2146_v63 = vld [vmem:[%s3519_s1 + $0x8] sm:$0xff]  ;;  %v2996_v5 = vpack.c.bf16 %v2148_v4, %v2147_v3 }
 0x3cb   : > { %v3653_v0 = vpop.eup %3122  ;;  %v1884_v11 = vmul.f32 1.442695, %v1883_v8 }
 0x3cc   : > { %v1377_v1 = vsel %vm784_vm3, %v3653_v0, 0.0  ;;  %v2053_v9 = vpop.xlane.xlu0 %2052  ;;  %v1383_v22 = vpop.permute.xlu1 %1382 }
 0x3cd   : > { %1378 = vadd.xlane.f32.xlu0 %v1377_v1  ;;  %v2054_v12 = vsub.f32 %v2050_v38, %v2053_v9  ;;  %3128 = vpow2.f32 %v1884_v11 }
 0x3cf   : > { %v2055_v13 = vmul.f32 1.442695, %v2054_v12  ;;  %v3125_v14 = vpop.eup %3124 }
 0x3d0   : > { %v1548_v16 = vsel %vm784_vm3, %v3125_v14, 0.0  ;;  %v1211_v23 = vpop.permute.xlu0 %1210 }
 0x3d1   : > { %3130 = vpow2.f32 %v2055_v13 }
 0x3d3   : > { %v3661_v15 = vpop.eup %3126 }
 0x3d4   : > { %v1715_v19 = vsel %vm784_vm3, %v3661_v15, 0.0 }
 0x3d7   : > { %v3664_v17 = vpop.eup %3128 }
 0x3d8   : > { %v1886_v18 = vsel %vm784_vm3, %v3664_v17, 0.0 }
 0x3da   : > { %1720 = vrot.lane.b32.xlu1 %v3582_v57, %s3285_s29 }
 0x3db   : > { %v3670_v20 = vpop.eup %3130 }
 0x3dc   : > { %v2057_v21 = vsel %vm784_vm3, %v3670_v20, 0.0 }
 0x3e3   : > { %1553 = vrot.lane.b32.xlu0 %v3582_v57, %s3286_s22 }
 0x3fe   : > { %1549 = vadd.xlane.f32.xlu1 %v1548_v16 }
 0x402   : > { %1887 = vadd.xlane.f32.xlu1 %v1886_v18  ;;  %1716 = vadd.xlane.f32.xlu0 %v1715_v19 }
 0x406   : > { %2058 = vadd.xlane.f32.xlu1 %v2057_v21 }
 0x417   : > { %2062 = vrot.lane.b32.xlu1 %v3582_v57, %s3287_s14 }
 0x418   : > { %1891 = vrot.lane.b32.xlu0 %v3582_v57, %s3288_s18 }
 0x44e   : > { %v868_v24 = vpop.xlane.xlu1 %867 }
 0x44f   : > { %3132 = vrcp.f32 %v868_v24 }
 0x452   : > { %v1035_v25 = vpop.xlane.xlu0 %1034 }
 0x453   : > { %3134 = vrcp.f32 %v1035_v25 }
 0x456   : > { %v1207_v26 = vpop.xlane.xlu1 %1206 }
 0x457   : > { %3136 = vrcp.f32 %v1207_v26 }
 0x459   : > { %v3133_v27 = vpop.eup %3132 }
 0x45a   : > { %v870_v28 = vmul.f32 %v3133_v27, %v3117_v58  ;;  %v1379_v29 = vpop.xlane.xlu0 %1378  ;;  %v1721_v36 = vpop.permute.xlu1 %1720 }
 0x45b   : > { %3138 = vrcp.f32 %v1379_v29 }
 0x45c   : > { %2871 = vmatmul.mubr.msk.f32.vlgmr.msra.gmra.mrb[4].mxu1 %vm784_vm3, %v870_v28 }
 0x45d   : > { %v3135_v30 = vpop.eup %3134  ;;  %2879 = vmatpush3.msra.mxu1 %v3648_v41  ;;  %2880 = vmatprep.mubr.msk.f32.mxu1 %vm3277_vm2, %v3276_v52 }
 0x45e   : > { %v1037_v57 = vmul.f32 %v3135_v30, %v3119_v60  ;;  %2888 = vmatprep.subr.mxu1 %v3276_v52  ;;  %v1554_v35 = vpop.permute.xlu0 %1553 }
 0x460   : > { %2881 = vmatmul.mubr.msk.f32.vlgmr.msra.gmra.mrb[6].mxu1 %vm784_vm3, %v1037_v57 }
 0x461   : > { %v3137_v31 = vpop.eup %3136  ;;  %2889 = vmatpush3.msra.mxu1 %v1211_v23  ;;  %2890 = vmatprep.mubr.msk.f32.mxu1 %vm3277_vm2, %v3276_v52 }
 0x462   : > { %v1209_v32 = vmul.f32 %v3137_v31, %v3121_v62  ;;  %2898 = vmatprep.subr.mxu1 %v3276_v52  ;;  %v2145_v62 = vld [vmem:[%s3519_s1] sm:$0xff] }
 0x463   : > { %v2992_v1 = vpack.c.bf16 %v2146_v63, %v2145_v62  ;;  %v2773_v63 = vld [vmem:[%s3536_s21 + $0x3] ss:$0 sm:$0xff] }
 0x464   : > { %2891 = vmatmul.mubr.msk.f32.vlgmr.msra.gmra.mrb[8].mxu1 %vm784_vm3, %v1209_v32 }
 0x465   : > { %v3139_v33 = vpop.eup %3138  ;;  %2899 = vmatpush3.msra.mxu1 %v1383_v22  ;;  %2900 = vmatprep.mubr.msk.f32.mxu1 %vm3277_vm2, %v3276_v52 }
 0x466   : > { %v1381_v34 = vmul.f32 %v3139_v33, %v3653_v0  ;;  %2908 = vmatprep.subr.mxu1 %v3276_v52  ;;  %2993 = vmatprep.subr.bf16.mxu0 %v2992_v1 }
 0x467   : > { %2995 = vmatpush3.bf16.msra.mxu0 %v2992_v1 }
 0x468   : > { %2901 = vmatmul.mubr.msk.f32.vlgmr.msra.gmra.mrb[10].mxu1 %vm784_vm3, %v1381_v34  ;;  %2997 = vmatprep.subr.bf16.mxu0 %v2996_v5 }
 0x469   : > { %2909 = vmatpush3.msra.mxu1 %v1554_v35  ;;  %2910 = vmatprep.mubr.msk.f32.mxu1 %vm3277_vm2, %v3276_v52 }
 0x46a   : > { %2918 = vmatprep.subr.mxu1 %v3276_v52 }
 0x46b   : > { %2999 = vmatpush3.bf16.msra.mxu0 %v2996_v5 }
 0x48b   : > { %v1550_v37 = vpop.xlane.xlu1 %1549 }
 0x48c   : > { %3140 = vrcp.f32 %v1550_v37  ;;  %v2279_v37 = vld [vmem:[%s3524_s7 + $0x8] sm:$0xff] }
 0x48f   : > { %v1888_v38 = vpop.xlane.xlu1 %1887  ;;  %v1717_v39 = vpop.xlane.xlu0 %1716 }
 0x490   : > { %3142 = vrcp.f32 %v1717_v39  ;;  %v2280_v39 = vld [vmem:[%s3524_s7 + $0x10] sm:$0xff] }
 0x491   : > { %3144 = vrcp.f32 %v1888_v38 }
 0x493   : > { %v2059_v40 = vpop.xlane.xlu1 %2058  ;;  %v1892_v46 = vpop.permute.xlu0 %1891 }
 0x494   : > { %3146 = vrcp.f32 %v2059_v40  ;;  %v2281_v40 = vld [vmem:[%s3524_s7 + $0x18] sm:$0xff] }
 0x496   : > { %v3141_v41 = vpop.eup %3140 }
 0x497   : > { %v1552_v42 = vmul.f32 %v3141_v41, %v3125_v14  ;;  %v2063_v50 = vpop.permute.xlu1 %2062  ;;  %v3004_v41 = vpack.c.bf16 %v2281_v40, %v2280_v39  ;;  %v2780_v39 = vld [vmem:[%s3536_s21 + $0x4] ss:$0 sm:$0xff] }
 0x499   : > { %2911 = vmatmul.mubr.msk.f32.vlgmr.msra.gmra.mrb[12].mxu1 %vm784_vm3, %v1552_v42  ;;  %v2372_v42 = vld [vmem:[%s3530_s20] sm:$0xff] }
 0x49a   : > { %2919 = vmatpush3.msra.mxu1 %v1721_v36  ;;  %2920 = vmatprep.mubr.msk.f32.mxu1 %vm3277_vm2, %v3276_v52  ;;  %v3143_v43 = vpop.eup %3142  ;;  %v2278_v36 = vld [vmem:[%s3524_s7] sm:$0xff] }
 0x49b   : > { %2928 = vmatprep.subr.mxu1 %v3276_v52  ;;  %v1719_v44 = vmul.f32 %v3143_v43, %v3661_v15  ;;  %v3145_v45 = vpop.eup %3144  ;;  %v3000_v38 = vpack.c.bf16 %v2279_v37, %v2278_v36  ;;  %v2373_v43 = vld [vmem:[%s3530_s20 + $0x8] sm:$0xff] }
 0x49c   : > { %v1890_v47 = vmul.f32 %v3145_v45, %v3664_v17  ;;  %v3008_v45 = vpack.c.bf16 %v2373_v43, %v2372_v42  ;;  %v2781_v42 = vld [vmem:[%s3536_s21 + $0x5] ss:$0 sm:$0xff] }
 0x49d   : > { %2921 = vmatmul.mubr.msk.f32.vlgmr.msra.gmra.mrb[14].mxu1 %vm784_vm3, %v1719_v44  ;;  %v2374_v44 = vld [vmem:[%s3530_s20 + $0x10] sm:$0xff] }
 0x49e   : > { %2929 = vmatpush3.msra.mxu1 %v1892_v46  ;;  %2930 = vmatprep.mubr.msk.f32.mxu1 %vm3277_vm2, %v3276_v52  ;;  %v3147_v48 = vpop.eup %3146  ;;  %v2375_v46 = vld [vmem:[%s3530_s20 + $0x18] sm:$0xff] }
 0x49f   : > { %2938 = vmatprep.subr.mxu1 %v3276_v52  ;;  %v2061_v53 = vmul.f32 %v3147_v48, %v3670_v20  ;;  %v2769_v20 = vld [vmem:[%s3536_s21] ss:$0 sm:$0xff]  ;;  %3009 = vmatprep.subr.bf16.mxu0 %v3008_v45 }
 0x4a0   : > { %v2376_v48 = vld [vmem:[%s3530_s20 + $0x20] sm:$0xff] }
 0x4a1   : > { %2931 = vmatmul.mubr.msk.f32.vlgmr.msra.gmra.mrb[16].mxu1 %vm784_vm3, %v1890_v47  ;;  %v3012_v47 = vpack.c.bf16 %v2375_v46, %v2374_v44 }
 0x4a2   : > { %2939 = vmatpush3.msra.mxu1 %v2063_v50  ;;  %2940 = vmatprep.mubr.msk.f32.mxu1 %vm3277_vm2, %v3276_v52  ;;  %v2377_v50 = vld [vmem:[%s3530_s20 + $0x28] sm:$0xff] }
 0x4a3   : > { %3001 = vmatprep.subr.bf16.mxu1 %v3000_v38 }
 0x4a5   : > { %2941 = vmatmul.mubr.msk.f32.vlgmr.msra.gmra.mrb[18].mxu1 %vm784_vm3, %v2061_v53  ;;  %v3016_v53 = vpack.c.bf16 %v2377_v50, %v2376_v48 }
 0x4a6   : > { %3003 = vmatpush3.bf16.msra.mxu1 %v3000_v38 }
 0x4a7   : > { %3005 = vmatprep.subr.bf16.mxu1 %v3004_v41 }
 0x4aa   : > { %3007 = vmatpush3.bf16.msra.mxu1 %v3004_v41 }
 0x52f   : > { %v943_v54 = vpop.f32.mrb[4].mxu1 }
 0x530   : > { %947 = vst.msk [vmem:[#allocation3] sm:$0xff] %vm784_vm3, %v943_v54  ;;  %v2872_v55 = vpop.f32.mrb[5].mxu1 }
 0x533   : > { %v1110_v58 = vpop.f32.mrb[6].mxu1 }
 0x534   : > { %1115 = vrot.lane.b32.xlu0 %v1110_v58, %s3289_s19  ;;  %v2882_v59 = vpop.f32.mrb[7].mxu1 }
 0x537   : > { %v1282_v56 = vpop.f32.mrb[8].mxu1 }
 0x538   : > { %1287 = vrot.lane.b32.xlu1 %v1282_v56, %s3290_s12  ;;  %v2892_v52 = vpop.f32.mrb[9].mxu1 }
 0x53b   : > { %v1454_v60 = vpop.f32.mrb[10].mxu1 }
 0x53c   : > { %1459 = vrot.lane.b32.xlu1 %v1454_v60, %s3291_s16  ;;  %v2902_v61 = vpop.f32.mrb[11].mxu1 }
 0x53d   : > { %v2772_v61 = vld [vmem:[%s3536_s21 + $0x2] ss:$0 sm:$0xff] }
 0x56c   : > { %v1625_v0 = vpop.f32.mrb[12].mxu1 }
 0x56d   : > { %1629 = vst.msk [vmem:[#allocation3 + $0x8] sm:$0xff] %vm784_vm3, %v1625_v0  ;;  %v2912_v2 = vpop.f32.mrb[13].mxu1 }
 0x570   : > { %v1792_v6 = vpop.f32.mrb[14].mxu1 }
 0x571   : > { %1797 = vrot.lane.b32.xlu0 %v1792_v6, %s3289_s19  ;;  %v2922_v7 = vpop.f32.mrb[15].mxu1  ;;  %v2378_v6 = vld [vmem:[%s3530_s20 + $0x30] sm:$0xff] }
 0x572   : > { %v2379_v7 = vld [vmem:[%s3530_s20 + $0x38] sm:$0xff] }
 0x574   : > { %v1963_v8 = vpop.f32.mrb[16].mxu1 }
 0x575   : > { %1968 = vrot.lane.b32.xlu0 %v1963_v8, %s3290_s12  ;;  %v2932_v9 = vpop.f32.mrb[17].mxu1  ;;  %v3020_v8 = vpack.c.bf16 %v2379_v7, %v2378_v6 }
 0x576   : > { %v2774_v9 = vld [vmem:[%s3496_s15] ss:$0 sm:$0xff] }
 0x578   : > { %v2134_v10 = vpop.f32.mrb[18].mxu1 }
 0x579   : > { %2139 = vrot.lane.b32.xlu1 %v2134_v10, %s3291_s16  ;;  %v2942_v11 = vpop.f32.mrb[19].mxu1 }
 0x5a6   : > { %v1116_v12 = vpop.permute.xlu0 %1115 }
 0x5a7   : > { %1119 = vst.msk [vmem:[#allocation3] sm:$0xff] %vm1118_vm4, %v1116_v12 }
 0x5aa   : > { %v1288_v13 = vpop.permute.xlu1 %1287 }
 0x5ab   : > { %1291 = vst.msk [vmem:[#allocation3] sm:$0xff] %vm1290_vm5, %v1288_v13 }
 0x5ae   : > { %v1460_v14 = vpop.permute.xlu1 %1459 }
 0x5af   : > { %1463 = vst.msk [vmem:[#allocation3] sm:$0xff] %vm1462_vm6, %v1460_v14 }
 0x5b6   : > { %v2143_v15 = vld [vmem:[#allocation3] sm:$0xff] }
 0x5b7   : > { %2951 = vmatprep.mubr.msk.f32.mxu0 %vm699_vm1, %v2143_v15 }
 0x5e3   : > { %v1798_v16 = vpop.permute.xlu0 %1797 }
 0x5e4   : > { %1800 = vst.msk [vmem:[#allocation3 + $0x8] sm:$0xff] %vm1118_vm4, %v1798_v16  ;;  %v2777_v16 = vld [vmem:[%s3536_s21 + $0x1] ss:$0 sm:$0xff] }
 0x5e7   : > { %v1969_v17 = vpop.permute.xlu0 %1968 }
 0x5e8   : > { %1971 = vst.msk [vmem:[#allocation3 + $0x8] sm:$0xff] %vm1290_vm5, %v1969_v17 }
 0x5eb   : > { %v2140_v18 = vpop.permute.xlu1 %2139 }
 0x5ec   : > { %2142 = vst.msk [vmem:[#allocation3 + $0x8] sm:$0xff] %vm1462_vm6, %v2140_v18 }
 0x5f3   : > { %v2144_v19 = vld [vmem:[#allocation3 + $0x8] sm:$0xff] }
 0x5f4   : > { %2952 = vmatmul.mubr.msk.f32.vlgmr.msra.gmra.mrb[14].mxu0 %vm699_vm1, %v2144_v19 }
 0x5f5   : > { %3011 = vmatpush3.bf16.msra.mxu0 %v3008_v45 }
 0x5f6   : > { %3013 = vmatprep.subr.bf16.mxu0 %v3012_v47 }
 0x5f9   : > { %3015 = vmatpush3.bf16.msra.mxu0 %v3012_v47 }
 0x5fa   : > { %3017 = vmatprep.subr.bf16.mxu0 %v3016_v53 }
 0x5fd   : > { %3019 = vmatpush3.bf16.msra.mxu0 %v3016_v53  ;;  %v2783_v53 = vld [vmem:[%s3787_s10] ss:$0 sm:$0xff] (!%p2782_p1) }
 0x5fe   : > { %3021 = vmatprep.subr.bf16.mxu0 %v3020_v8 }
 0x601   : > { %3023 = vmatpush3.bf16.msra.mxu0 %v3020_v8 }
 0x6c7   : > { %v2953_v21 = vpop.f32.mrb[14].mxu0 }
 0x6c8   : > { %v2232_v22 = vadd.f32 %v2953_v21, %v2769_v20  ;;  %v2226_v23 = vpop.f32.mrb[15].mxu0 }
 0x6c9   : > { %v2227_v24 = vadd.f32 %v2769_v20, %v2226_v23 }
 0x6ca   : > { %v2236_v25 = vadd.f32 %v2232_v22, %v3559_v51 }
 0x6cb   : > { %v2235_v26 = vadd.f32 %v2227_v24, %v3555_v49 }
 0x6cc   : > { %v2242_v27 = vsel %vm699_vm1, %v2236_v25, 0.0 }
 0x6cd   : > { %2243 = vadd.xlane.f32.xlu1 %v2242_v27  ;;  %v2239_v28 = vsel %vm699_vm1, %v2235_v26, 0.0 }
 0x6ce   : > { %2240 = vadd.xlane.f32.xlu0 %v2239_v28 }
 0x75a   : > { %v2244_v29 = vpop.xlane.xlu1 %2243 }
 0x75b   : > { %v2247_v30 = vmul.f32 0.03125, %v2244_v29  ;;  %v2241_v57 = vpop.xlane.xlu0 %2240 }
 0x75c   : > { %v2246_v31 = vmul.f32 0.03125, %v2241_v57 }
 0x75d   : > { %v2249_v32 = vsub.f32 %v2236_v25, %v2247_v30 }
 0x75e   : > { %v2248_v33 = vsub.f32 %v2235_v26, %v2246_v31 }
 0x75f   : > { %v2251_v51 = vmul.f32 %v2249_v32, %v2249_v32 }
 0x760   : > { %v2250_v34 = vmul.f32 %v2248_v33, %v2248_v33 }
 0x761   : > { %v2255_v35 = vsel %vm699_vm1, %v2251_v51, 0.0 }
 0x762   : > { %v2252_v49 = vsel %vm699_vm1, %v2250_v34, 0.0 }
 0x763   : > { %2253 = vadd.xlane.f32.xlu0 %v2252_v49 }
 0x767   : > { %2256 = vadd.xlane.f32.xlu0 %v2255_v35 }
 0x7f0   : > { %v2254_v54 = vpop.xlane.xlu0 %2253 }
 0x7f1   : > { %v2258_v55 = vmul.f32 0.03125, %v2254_v54 }
 0x7f3   : > { %v2260_v58 = vadd.f32 1e-05, %v2258_v55 }
 0x7f4   : > { %v2257_v59 = vpop.xlane.xlu0 %2256 }
 0x7f5   : > { %3148 = vrsqrt.f32 %v2260_v58  ;;  %v2259_v56 = vmul.f32 0.03125, %v2257_v59  ;;  %v2784_v59 = vld [vmem:[#allocation4] ss:$0 sm:$0xff] (!%p2782_p1) }
 0x7f7   : > { %v2261_v52 = vadd.f32 1e-05, %v2259_v56 }
 0x7f9   : > { %3150 = vrsqrt.f32 %v2261_v52 }
 0x7ff   : > { %v3149_v60 = vpop.eup %3148 }
 0x800   : > { %v2264_v62 = vmul.f32 %v3149_v60, %v2248_v33 }
 0x802   : > { %v2270_v0 = vmul.f32 %v2772_v61, %v2264_v62 }
 0x803   : > { %v3151_v1 = vpop.eup %3150 }
 0x804   : > { %v2265_v2 = vmul.f32 %v3151_v1, %v2249_v32  ;;  %v2276_v3 = vadd.f32 %v2773_v63, %v2270_v0 }
 0x806   : > { %v2271_v4 = vmul.f32 %v2772_v61, %v2265_v2  ;;  %2962 = vmatprep.mubr.msk.f32.mxu1 %vm699_vm1, %v2276_v3 }
 0x808   : > { %v2277_v5 = vadd.f32 %v2773_v63, %v2271_v4 }
 0x80a   : > { %2963 = vmatmul.mubr.msk.f32.vlgmr.msra.gmra.mrb[20].mxu1 %vm699_vm1, %v2277_v5 }
 0x8dd   : > { %v2964_v10 = vpop.f32.mrb[20].mxu1 }
 0x8de   : > { %v2367_v11 = vadd.f32 %v2964_v10, %v2774_v9  ;;  %v2361_v12 = vpop.f32.mrb[21].mxu1 }
 0x8df   : > { %v2362_v13 = vadd.f32 %v2774_v9, %v2361_v12 }
 0x8e0   : > { %v2371_v15 = vmax.f32 %v2367_v11, 0.0 }
 0x8e1   : > { %v2370_v14 = vmax.f32 %v2362_v13, 0.0 }
 0x8e3   : > { %2981 = vmatprep.mubr.msk.f32.mxu0 %vm2385_vm7, %v2370_v14 }
 0x8e4   : > { %2982 = vmatmul.mubr.msk.f32.vlgmr.msra.gmra.mrb[16].mxu0 %vm2385_vm7, %v2371_v15 }
 0x9b7   : > { %v2983_v17 = vpop.f32.mrb[16].mxu0 }
 0x9b8   : > { %v2464_v18 = vadd.f32 %v2983_v17, %v2777_v16  ;;  %v2458_v19 = vpop.f32.mrb[17].mxu0 }
 0x9b9   : > { %v2459_v20 = vadd.f32 %v2777_v16, %v2458_v19 }
 0x9ba   : > { %v2468_v21 = vadd.f32 %v2464_v18, %v2277_v5 }
 0x9bb   : > { %v2467_v22 = vadd.f32 %v2459_v20, %v2276_v3 }
 0x9bc   : > { %v2474_v23 = vsel %vm699_vm1, %v2468_v21, 0.0 }
 0x9bd   : > { %2475 = vadd.xlane.f32.xlu0 %v2474_v23  ;;  %v2471_v24 = vsel %vm699_vm1, %v2467_v22, 0.0 }
 0x9be   : > { %2472 = vadd.xlane.f32.xlu1 %v2471_v24 }
 0xa4a   : > { %v2476_v25 = vpop.xlane.xlu0 %2475 }
 0xa4b   : > { %v2478_v26 = vmul.f32 0.03125, %v2476_v25  ;;  %v2473_v27 = vpop.xlane.xlu1 %2472 }
 0xa4c   : > { %v2477_v28 = vmul.f32 0.03125, %v2473_v27 }
 0xa4d   : > { %v2480_v29 = vsub.f32 %v2468_v21, %v2478_v26 }
 0xa4e   : > { %v2479_v30 = vsub.f32 %v2467_v22, %v2477_v28 }
 0xa4f   : > { %v2482_v57 = vmul.f32 %v2480_v29, %v2480_v29 }
 0xa50   : > { %v2481_v31 = vmul.f32 %v2479_v30, %v2479_v30 }
 0xa51   : > { %v2486_v32 = vsel %vm699_vm1, %v2482_v57, 0.0 }
 0xa52   : > { %2487 = vadd.xlane.f32.xlu0 %v2486_v32  ;;  %v2483_v33 = vsel %vm699_vm1, %v2481_v31, 0.0 }
 0xa53   : > { %2484 = vadd.xlane.f32.xlu1 %v2483_v33 }
 0xadf   : > { %v2488_v34 = vpop.xlane.xlu0 %2487 }
 0xae0   : > { %v2490_v49 = vmul.f32 0.03125, %v2488_v34  ;;  %v2485_v51 = vpop.xlane.xlu1 %2484 }
 0xae1   : > { %v2489_v35 = vmul.f32 0.03125, %v2485_v51 }
 0xae2   : > { %v2492_v36 = vadd.f32 1e-05, %v2490_v49 }
 0xae3   : > { %v2491_v37 = vadd.f32 1e-05, %v2489_v35 }
 0xae4   : > { %3152 = vrsqrt.f32 %v2492_v36 }
 0xae5   : > { %3154 = vrsqrt.f32 %v2491_v37 }
 0xaee   : > { %v3153_v38 = vpop.eup %3152 }
 0xaef   : > { %v3155_v40 = vpop.eup %3154  ;;  %v2496_v41 = vmul.f32 %v3153_v38, %v2480_v29 }
 0xaf0   : > { %v2495_v43 = vmul.f32 %v3155_v40, %v2479_v30  ;;  %2514 = sbr.rel (%p2782_p1) target bundleno = 2957 (0xb8d), region = 84 }
 0xaf1   : > { %v2502_v44 = vmul.f32 %v2780_v39, %v2496_v41 }
 0xaf2   : > { %v2501_v45 = vmul.f32 %v2780_v39, %v2495_v43 }
 0xaf3   : > { %v2508_v46 = vadd.f32 %v2781_v42, %v2502_v44 }
 0xaf4   : > { %v2507_v47 = vadd.f32 %v2781_v42, %v2501_v45 }
 0xaf5   : > { %2510 = vst.msk [vmem:[#allocation2 + $0x8] sm:$0xff] %vm699_vm1, %v2508_v46  ;;  %v2519_v50 = vrot.slane (!%p2782_p1), %v2508_v46, 6 }
 0xaf6   : > { %2509 = vst.msk [vmem:[#allocation2] sm:$0xff] %vm699_vm1, %v2507_v47  ;;  %v2516_v48 = vrot.slane (!%p2782_p1), %v2507_v47, 7 }
 0xaf8   : > { %v2522_v54 = vsel %vm2521_vm8, %v2516_v48, %v2519_v50 }
 0xaf9   : > { %v2530_v55 = vmul.f32 %v2783_v53, %v2522_v54 }
 0xafb   : > { %v2532_v58 = vsel %vm2531_vm9, %v2530_v55, 0.0 }
 0xafc   : > { %2533 = vadd.xlane.f32.xlu0 %v2532_v58 }
 0xb89   : > { %v2534_v56 = vpop.xlane.xlu0 %2533 }
 0xb8a   : > { %v2542_v52 = vadd.f32 %v2784_v59, %v2534_v56 }
 0xb8c   : > { %2544 = vst.msk [vmem:[%s3816_s26] sm:$0x3] %vm2543_vm10, %v2542_v52 }
 0xb8d PF: > { %s28_s28 = sadd.s32 1, %s3268_s28   ;;  %s3817_s20 = sld [smem:[#allocation13_spill]] }
 0xb8e   : > { %p25_p4 = scmp.ge.s32.totalorder %s28_s28, 4   ;;  %s3818_s26 = sld [smem:[#allocation11_spill]] }
 0xb8f   : > { %s3819_s27 = sld [smem:[#allocation12_spill]]  ;;  %s3820_s23 = smov %s3252_s24 }
 0xb90   : > { %s3821_s24 = smov %s3256_s25  ;;  %27 = sbr.rel (!%p25_p4) target bundleno = 9 (0x9), region = 145 }
 0xb93   : > { %s3822_s25 = smov %s3817_s20 }
 0xb97   :  { %2564 = vsyncpa [#allocation6], 1 }
 0xb98   :  { %2566 = vsyncpa [#allocation6 + $0x1], 1 }
 0xb99   :  { %2567 = vsyncpa [#allocation8], 1 }
 0xb9a   :  { %2569 = vsyncpa [#allocation8 + $0x1], 1 }

</bundles_post_ra>
